<compile_context>
chip_gen: v5e
topology: v5e:2x2
jax: 0.10.0
libtpu: 0.0.40
codegen_flags: <defaults>
</compile_context>

<pallas_src>
import jax
import jax.numpy as jnp
from jax.experimental import pallas as pl
from jax.experimental.pallas import tpu as pltpu


# -----------------------------------------------------------------------------
# Fused kernel: all LSTM layers + MLP head in one invocation (grid=()).
# -----------------------------------------------------------------------------
def _make_fused_kernel(num_layers, seq_len, batch_pad, hidden, fc1_out):
    T, Bp, H = seq_len, batch_pad, hidden

    def kernel(*refs):
        x_ref, h0_ref, c0_ref = refs[0], refs[1], refs[2]
        layer_refs = refs[3:3 + 3 * num_layers]
        (fc1_w_ref, fc1_b_ref, fc2_w_ref, fc2_b_ref,
         out_ref, inter_ref) = refs[3 + 3 * num_layers:]

        # fc1 pre-activation accumulator (filled in-loop during the last layer).
        h1_acc = jnp.zeros((Bp, fc1_out), jnp.float32)

        for layer in range(num_layers):
            wih_ref = layer_refs[3 * layer + 0]   # (D_in, 4H)  columns [i|f|g|o]
            whh_ref = layer_refs[3 * layer + 1]   # (H, 4H)   = W_hh^T, same order
            b_ref = layer_refs[3 * layer + 2]     # (1, 4H)   = b_ih + b_hh
            last = (layer + 1 == num_layers)

            # Time-major input rows (row index = t*Bp + b).
            inp = x_ref[...] if layer == 0 else inter_ref[...]

            # Input projection for ALL T steps in one matmul (off the serial
            # dependence chain).
            xp = jnp.dot(inp, wih_ref[...],
                         preferred_element_type=jnp.float32) + b_ref[...]
            whh = whh_ref[...]                    # (H, 4H) single recurrent RHS

            h = h0_ref[layer]                     # (Bp, H)
            c = c0_ref[layer]                     # (Bp, H)
            for t in range(T):                    # static unroll; T fixed, small
                # ONE fused recurrent dot per step; xp slice is a whole aligned
                # f32 vreg (Bp=8 sublanes x 4H=128 lanes).
                gates = xp[t * Bp:(t + 1) * Bp, :] + jnp.dot(
                    h, whh, preferred_element_type=jnp.float32)
                s = jax.nn.sigmoid(gates)         # one EUP pass over all 128 lanes
                i_t = s[:, 0 * H:1 * H]
                f_t = s[:, 1 * H:2 * H]
                o_t = s[:, 3 * H:4 * H]
                g_t = jnp.tanh(gates[:, 2 * H:3 * H])
                c = f_t * c + i_t * g_t
                h = o_t * jnp.tanh(c)
                if last:
                    # fc1 partial product (replaces the (B, T*H) slab/concat);
                    # off the recurrence chain, overlapped with the serial loop.
                    h1_acc = h1_acc + jnp.dot(
                        h, fc1_w_ref[t * H:(t + 1) * H, :],
                        preferred_element_type=jnp.float32)
                else:
                    # TODO(synk): nn.LSTM inter-layer dropout(0.3) is train-time
                    # only; eval semantics are identity, intentionally omitted.
                    # Aligned 8-sublane store, off the serial chain.
                    inter_ref[t * Bp:(t + 1) * Bp, :] = h

        # MLP head tail fused into the same kernel.
        h1 = jnp.maximum(h1_acc + fc1_b_ref[...], 0.0)
        y = jnp.dot(h1, fc2_w_ref[...],
                    preferred_element_type=jnp.float32) + fc2_b_ref[...]
        out_ref[...] = jnp.maximum(y, 0.0)

    return kernel


# -----------------------------------------------------------------------------
# One-time parameter layout prep (kept OUT of the per-call path).
# -----------------------------------------------------------------------------
def prepare_params(params):
    prepped = {"layers": []}
    for p in params["lstm"]:
        prepped["layers"].append({
            "wih_t": jnp.transpose(p["w_ih"]),                 # (D_in, 4H)
            "whh_t": jnp.transpose(p["w_hh"]),                 # (H, 4H)
            "bias": (p["b_ih"] + p["b_hh"]).reshape(1, -1),    # (1, 4H)
        })
    prepped["fc1_w_t"] = jnp.transpose(params["fc1_w"])        # (T*H, 5H)
    prepped["fc1_b"] = params["fc1_b"].reshape(1, -1)
    prepped["fc2_w_t"] = jnp.transpose(params["fc2_w"])        # (5H, 2)
    prepped["fc2_b"] = params["fc2_b"].reshape(1, -1)
    return jax.tree_util.tree_map(jnp.asarray, prepped)


# -----------------------------------------------------------------------------
# Wrapper: single fused pallas_call (whole-array VMEM operands, no grid).
# Only tiny per-call activation prep (seq transpose + batch pad) stays here.
# -----------------------------------------------------------------------------
@jax.jit
def lstm_forward(prepped, seq, h0, c0):
    """seq: (B, T, input_size) batch_first; returns (B, 2)."""
    B, T, D = seq.shape
    H = h0.shape[-1]
    L = len(prepped["layers"])
    fc1_out = prepped["fc1_w_t"].shape[1]
    Bp = max(8, ((B + 7) // 8) * 8)      # fill all 8 sublanes of every vreg

    x_tm = jnp.transpose(seq, (1, 0, 2))                       # (T, B, D)
    x_tm = jnp.pad(x_tm, ((0, 0), (0, Bp - B), (0, 0)))
    x_flat = x_tm.reshape(T * Bp, D)                           # time-major rows
    h0p = jnp.pad(h0, ((0, 0), (0, Bp - B), (0, 0)))
    c0p = jnp.pad(c0, ((0, 0), (0, Bp - B), (0, 0)))

    args = [x_flat, h0p, c0p]
    for lp in prepped["layers"]:
        args += [lp["wih_t"], lp["whh_t"], lp["bias"]]
    args += [prepped["fc1_w_t"], prepped["fc1_b"],
             prepped["fc2_w_t"], prepped["fc2_b"]]

    vmem = pl.BlockSpec(memory_space=pltpu.MemorySpace.VMEM)
    out = pl.pallas_call(
        _make_fused_kernel(L, T, Bp, H, fc1_out),
        out_shape=jax.ShapeDtypeStruct((Bp, 2), jnp.float32),
        in_specs=[vmem] * len(args),
        out_specs=vmem,
        scratch_shapes=[pltpu.VMEM((T * Bp, H), jnp.float32)],  # inter-layer buf
    )(*args)
    return out[:B]


# -----------------------------------------------------------------------------
# Parameter construction (deterministic, PyTorch-style uniform init ranges).
# -----------------------------------------------------------------------------
def init_params(key, input_size, hidden, num_layers, bin_length):
    params = {"lstm": []}
    k = 1.0 / jnp.sqrt(hidden)
    for layer in range(num_layers):
        d_in = input_size if layer == 0 else hidden
        key, k1, k2, k3, k4 = jax.random.split(key, 5)
        params["lstm"].append({
            "w_ih": jax.random.uniform(k1, (4 * hidden, d_in), jnp.float32, -k, k),
            "w_hh": jax.random.uniform(k2, (4 * hidden, hidden), jnp.float32, -k, k),
            "b_ih": jax.random.uniform(k3, (4 * hidden,), jnp.float32, -k, k),
            "b_hh": jax.random.uniform(k4, (4 * hidden,), jnp.float32, -k, k),
        })
    fc1_in = hidden * bin_length
    fc1_out = hidden * 5
    kf1 = 1.0 / jnp.sqrt(fc1_in)
    kf2 = 1.0 / jnp.sqrt(fc1_out)
    key, k1, k2, k3, k4 = jax.random.split(key, 5)
    params["fc1_w"] = jax.random.uniform(k1, (fc1_out, fc1_in), jnp.float32, -kf1, kf1)
    params["fc1_b"] = jax.random.uniform(k2, (fc1_out,), jnp.float32, -kf1, kf1)
    params["fc2_w"] = jax.random.uniform(k3, (2, fc1_out), jnp.float32, -kf2, kf2)
    params["fc2_b"] = jax.random.uniform(k4, (2,), jnp.float32, -kf2, kf2)
    return params


# -----------------------------------------------------------------------------
# Pure-JAX reference (mirrors nn.LSTM eval + fc head) for a correctness check.
# -----------------------------------------------------------------------------
def _reference_forward(params, seq, h0, c0, hidden):
    B, T, _ = seq.shape
    x = seq
    for layer, p in enumerate(params["lstm"]):
        h, c = h0[layer], c0[layer]
        outs = []
        for t in range(T):
            gates = (x[:, t, :] @ p["w_ih"].T + p["b_ih"]
                     + h @ p["w_hh"].T + p["b_hh"])
            i = jax.nn.sigmoid(gates[:, 0:hidden])
            f = jax.nn.sigmoid(gates[:, hidden:2 * hidden])
            g = jnp.tanh(gates[:, 2 * hidden:3 * hidden])
            o = jax.nn.sigmoid(gates[:, 3 * hidden:4 * hidden])
            c = f * c + i * g
            h = o * jnp.tanh(c)
            outs.append(h)
        x = jnp.stack(outs, axis=1)                    # (B, T, H)
    flat = x[:, :, -hidden:].reshape(B, -1)
    y = jnp.maximum(flat @ params["fc1_w"].T + params["fc1_b"], 0.0)
    y = jnp.maximum(y @ params["fc2_w"].T + params["fc2_b"], 0.0)
    return y


if __name__ == "__main__":
    input_size = 8
    batch_size = 2
    hidden = 32
    num_layers = 2
    bin_length = 8   # sequence length (== T expected by fc1)

    key = jax.random.PRNGKey(0)
    key, kp, kx, kh, kc = jax.random.split(key, 5)

    params = init_params(kp, input_size, hidden, num_layers, bin_length)
    prepped = prepare_params(params)   # one-time layout prep, not per call

    seq = jax.random.normal(kx, (batch_size, bin_length, input_size), jnp.float32)
    # init_hidden_lstm uses torch.randn; reproduced with deterministic normals.
    h0 = jax.random.normal(kh, (num_layers, batch_size, hidden), jnp.float32)
    c0 = jax.random.normal(kc, (num_layers, batch_size, hidden), jnp.float32)

    out = lstm_forward(prepped, seq, h0, c0)
    jax.block_until_ready(out)
    assert out.shape == (batch_size, 2)

    ref = _reference_forward(params, seq, h0, c0, hidden)
    assert jnp.allclose(out, ref, rtol=1e-3, atol=1e-3), \
        float(jnp.max(jnp.abs(out - ref)))
    print("KERNEL_OK")
</pallas_src>

<mosaic_0001>
module attributes {stable_mosaic.version = 11 : i64} {
  func.func @kernel(%arg0: memref<64x8xf32, #tpu.memory_space<vmem>>, %arg1: memref<2x8x32xf32, #tpu.memory_space<vmem>>, %arg2: memref<2x8x32xf32, #tpu.memory_space<vmem>>, %arg3: memref<8x128xf32, #tpu.memory_space<vmem>>, %arg4: memref<32x128xf32, #tpu.memory_space<vmem>>, %arg5: memref<1x128xf32, #tpu.memory_space<vmem>>, %arg6: memref<32x128xf32, #tpu.memory_space<vmem>>, %arg7: memref<32x128xf32, #tpu.memory_space<vmem>>, %arg8: memref<1x128xf32, #tpu.memory_space<vmem>>, %arg9: memref<256x160xf32, #tpu.memory_space<vmem>>, %arg10: memref<1x160xf32, #tpu.memory_space<vmem>>, %arg11: memref<160x2xf32, #tpu.memory_space<vmem>>, %arg12: memref<1x2xf32, #tpu.memory_space<vmem>>, %arg13: memref<8x2xf32, #tpu.memory_space<vmem>>, %arg14: memref<64x32xf32, #tpu.memory_space<vmem>>) attributes {dimension_semantics = [], scalar_prefetch = 0 : i64, scratch_operands = 1 : i64, tpu.core_type = #tpu.core_type<tc>} {
    %cst = arith.constant 0.000000e+00 : f32
    %0 = vector.broadcast %cst : f32 to vector<8x160xf32>
    %c0 = arith.constant 0 : index
    %c0_0 = arith.constant 0 : index
    %1 = vector.load %arg0[%c0, %c0_0] : memref<64x8xf32, #tpu.memory_space<vmem>>, vector<64x8xf32>
    %c0_1 = arith.constant 0 : index
    %c0_2 = arith.constant 0 : index
    %2 = vector.load %arg3[%c0_1, %c0_2] : memref<8x128xf32, #tpu.memory_space<vmem>>, vector<8x128xf32>
    %cst_3 = arith.constant dense<0.000000e+00> : vector<64x128xf32>
    %3 = tpu.matmul %1, %2, %cst_3 {dimension_numbers = #tpu.dot_dimension_numbers<[1], [0], [0], [1], [0, 0, 1, 1], [], []>} : vector<64x8xf32>, vector<8x128xf32>, vector<64x128xf32> -> vector<64x128xf32>
    %c0_4 = arith.constant 0 : index
    %c0_5 = arith.constant 0 : index
    %4 = vector.load %arg5[%c0_4, %c0_5] : memref<1x128xf32, #tpu.memory_space<vmem>>, vector<1x128xf32>
    %5 = vector.broadcast %4 : vector<1x128xf32> to vector<64x128xf32>
    %6 = arith.addf %3, %5 : vector<64x128xf32>
    %c0_6 = arith.constant 0 : index
    %c0_7 = arith.constant 0 : index
    %7 = vector.load %arg4[%c0_6, %c0_7] : memref<32x128xf32, #tpu.memory_space<vmem>>, vector<32x128xf32>
    %c0_8 = arith.constant 0 : index
    %c0_9 = arith.constant 0 : index
    %c0_10 = arith.constant 0 : index
    %8 = vector.load %arg1[%c0_8, %c0_9, %c0_10] : memref<2x8x32xf32, #tpu.memory_space<vmem>>, vector<1x8x32xf32>
    %9 = vector.shape_cast %8 : vector<1x8x32xf32> to vector<8x32xf32>
    %c0_11 = arith.constant 0 : index
    %c0_12 = arith.constant 0 : index
    %c0_13 = arith.constant 0 : index
    %10 = vector.load %arg2[%c0_11, %c0_12, %c0_13] : memref<2x8x32xf32, #tpu.memory_space<vmem>>, vector<1x8x32xf32>
    %11 = vector.shape_cast %10 : vector<1x8x32xf32> to vector<8x32xf32>
    %12 = vector.extract_strided_slice %6 {offsets = [0, 0], sizes = [8, 128], strides = [1, 1]} : vector<64x128xf32> to vector<8x128xf32>
    %cst_14 = arith.constant dense<0.000000e+00> : vector<8x128xf32>
    %13 = tpu.matmul %9, %7, %cst_14 {dimension_numbers = #tpu.dot_dimension_numbers<[1], [0], [0], [1], [0, 0, 1, 1], [], []>} : vector<8x32xf32>, vector<32x128xf32>, vector<8x128xf32> -> vector<8x128xf32>
    %14 = arith.addf %12, %13 : vector<8x128xf32>
    %15 = arith.negf %14 : vector<8x128xf32>
    %16 = math.exp %15 : vector<8x128xf32>
    %cst_15 = arith.constant 1.000000e+00 : f32
    %17 = vector.broadcast %cst_15 : f32 to vector<8x128xf32>
    %18 = arith.addf %17, %16 : vector<8x128xf32>
    %19 = arith.divf %17, %18 : vector<8x128xf32>
    %20 = vector.extract_strided_slice %19 {offsets = [0, 0], sizes = [8, 32], strides = [1, 1]} : vector<8x128xf32> to vector<8x32xf32>
    %21 = vector.extract_strided_slice %19 {offsets = [0, 32], sizes = [8, 32], strides = [1, 1]} : vector<8x128xf32> to vector<8x32xf32>
    %22 = vector.extract_strided_slice %19 {offsets = [0, 96], sizes = [8, 32], strides = [1, 1]} : vector<8x128xf32> to vector<8x32xf32>
    %23 = vector.extract_strided_slice %14 {offsets = [0, 64], sizes = [8, 32], strides = [1, 1]} : vector<8x128xf32> to vector<8x32xf32>
    %24 = math.tanh %23 : vector<8x32xf32>
    %25 = arith.mulf %21, %11 : vector<8x32xf32>
    %26 = arith.mulf %20, %24 : vector<8x32xf32>
    %27 = arith.addf %25, %26 : vector<8x32xf32>
    %28 = math.tanh %27 : vector<8x32xf32>
    %29 = arith.mulf %22, %28 : vector<8x32xf32>
    %c0_16 = arith.constant 0 : index
    %c0_17 = arith.constant 0 : index
    %30 = vector.load %arg14[%c0_16, %c0_17] : memref<64x32xf32, #tpu.memory_space<vmem>>, vector<8x32xf32>
    tpu.vector_store %arg14[%c0_16, %c0_17], %29 {strides = array<i32>} : memref<64x32xf32, #tpu.memory_space<vmem>>, vector<8x32xf32>,
    %31 = vector.extract_strided_slice %6 {offsets = [8, 0], sizes = [8, 128], strides = [1, 1]} : vector<64x128xf32> to vector<8x128xf32>
    %cst_18 = arith.constant dense<0.000000e+00> : vector<8x128xf32>
    %32 = tpu.matmul %29, %7, %cst_18 {dimension_numbers = #tpu.dot_dimension_numbers<[1], [0], [0], [1], [0, 0, 1, 1], [], []>} : vector<8x32xf32>, vector<32x128xf32>, vector<8x128xf32> -> vector<8x128xf32>
    %33 = arith.addf %31, %32 : vector<8x128xf32>
    %34 = arith.negf %33 : vector<8x128xf32>
    %35 = math.exp %34 : vector<8x128xf32>
    %cst_19 = arith.constant 1.000000e+00 : f32
    %36 = vector.broadcast %cst_19 : f32 to vector<8x128xf32>
    %37 = arith.addf %36, %35 : vector<8x128xf32>
    %38 = arith.divf %36, %37 : vector<8x128xf32>
    %39 = vector.extract_strided_slice %38 {offsets = [0, 0], sizes = [8, 32], strides = [1, 1]} : vector<8x128xf32> to vector<8x32xf32>
    %40 = vector.extract_strided_slice %38 {offsets = [0, 32], sizes = [8, 32], strides = [1, 1]} : vector<8x128xf32> to vector<8x32xf32>
    %41 = vector.extract_strided_slice %38 {offsets = [0, 96], sizes = [8, 32], strides = [1, 1]} : vector<8x128xf32> to vector<8x32xf32>
    %42 = vector.extract_strided_slice %33 {offsets = [0, 64], sizes = [8, 32], strides = [1, 1]} : vector<8x128xf32> to vector<8x32xf32>
    %43 = math.tanh %42 : vector<8x32xf32>
    %44 = arith.mulf %40, %27 : vector<8x32xf32>
    %45 = arith.mulf %39, %43 : vector<8x32xf32>
    %46 = arith.addf %44, %45 : vector<8x32xf32>
    %47 = math.tanh %46 : vector<8x32xf32>
    %48 = arith.mulf %41, %47 : vector<8x32xf32>
    %c8 = arith.constant 8 : index
    %c0_20 = arith.constant 0 : index
    %49 = vector.load %arg14[%c8, %c0_20] : memref<64x32xf32, #tpu.memory_space<vmem>>, vector<8x32xf32>
    tpu.vector_store %arg14[%c8, %c0_20], %48 {strides = array<i32>} : memref<64x32xf32, #tpu.memory_space<vmem>>, vector<8x32xf32>,
    %50 = vector.extract_strided_slice %6 {offsets = [16, 0], sizes = [8, 128], strides = [1, 1]} : vector<64x128xf32> to vector<8x128xf32>
    %cst_21 = arith.constant dense<0.000000e+00> : vector<8x128xf32>
    %51 = tpu.matmul %48, %7, %cst_21 {dimension_numbers = #tpu.dot_dimension_numbers<[1], [0], [0], [1], [0, 0, 1, 1], [], []>} : vector<8x32xf32>, vector<32x128xf32>, vector<8x128xf32> -> vector<8x128xf32>
    %52 = arith.addf %50, %51 : vector<8x128xf32>
    %53 = arith.negf %52 : vector<8x128xf32>
    %54 = math.exp %53 : vector<8x128xf32>
    %cst_22 = arith.constant 1.000000e+00 : f32
    %55 = vector.broadcast %cst_22 : f32 to vector<8x128xf32>
    %56 = arith.addf %55, %54 : vector<8x128xf32>
    %57 = arith.divf %55, %56 : vector<8x128xf32>
    %58 = vector.extract_strided_slice %57 {offsets = [0, 0], sizes = [8, 32], strides = [1, 1]} : vector<8x128xf32> to vector<8x32xf32>
    %59 = vector.extract_strided_slice %57 {offsets = [0, 32], sizes = [8, 32], strides = [1, 1]} : vector<8x128xf32> to vector<8x32xf32>
    %60 = vector.extract_strided_slice %57 {offsets = [0, 96], sizes = [8, 32], strides = [1, 1]} : vector<8x128xf32> to vector<8x32xf32>
    %61 = vector.extract_strided_slice %52 {offsets = [0, 64], sizes = [8, 32], strides = [1, 1]} : vector<8x128xf32> to vector<8x32xf32>
    %62 = math.tanh %61 : vector<8x32xf32>
    %63 = arith.mulf %59, %46 : vector<8x32xf32>
    %64 = arith.mulf %58, %62 : vector<8x32xf32>
    %65 = arith.addf %63, %64 : vector<8x32xf32>
    %66 = math.tanh %65 : vector<8x32xf32>
    %67 = arith.mulf %60, %66 : vector<8x32xf32>
    %c16 = arith.constant 16 : index
    %c0_23 = arith.constant 0 : index
    %68 = vector.load %arg14[%c16, %c0_23] : memref<64x32xf32, #tpu.memory_space<vmem>>, vector<8x32xf32>
    tpu.vector_store %arg14[%c16, %c0_23], %67 {strides = array<i32>} : memref<64x32xf32, #tpu.memory_space<vmem>>, vector<8x32xf32>,
    %69 = vector.extract_strided_slice %6 {offsets = [24, 0], sizes = [8, 128], strides = [1, 1]} : vector<64x128xf32> to vector<8x128xf32>
    %cst_24 = arith.constant dense<0.000000e+00> : vector<8x128xf32>
    %70 = tpu.matmul %67, %7, %cst_24 {dimension_numbers = #tpu.dot_dimension_numbers<[1], [0], [0], [1], [0, 0, 1, 1], [], []>} : vector<8x32xf32>, vector<32x128xf32>, vector<8x128xf32> -> vector<8x128xf32>
    %71 = arith.addf %69, %70 : vector<8x128xf32>
    %72 = arith.negf %71 : vector<8x128xf32>
    %73 = math.exp %72 : vector<8x128xf32>
    %cst_25 = arith.constant 1.000000e+00 : f32
    %74 = vector.broadcast %cst_25 : f32 to vector<8x128xf32>
    %75 = arith.addf %74, %73 : vector<8x128xf32>
    %76 = arith.divf %74, %75 : vector<8x128xf32>
    %77 = vector.extract_strided_slice %76 {offsets = [0, 0], sizes = [8, 32], strides = [1, 1]} : vector<8x128xf32> to vector<8x32xf32>
    %78 = vector.extract_strided_slice %76 {offsets = [0, 32], sizes = [8, 32], strides = [1, 1]} : vector<8x128xf32> to vector<8x32xf32>
    %79 = vector.extract_strided_slice %76 {offsets = [0, 96], sizes = [8, 32], strides = [1, 1]} : vector<8x128xf32> to vector<8x32xf32>
    %80 = vector.extract_strided_slice %71 {offsets = [0, 64], sizes = [8, 32], strides = [1, 1]} : vector<8x128xf32> to vector<8x32xf32>
    %81 = math.tanh %80 : vector<8x32xf32>
    %82 = arith.mulf %78, %65 : vector<8x32xf32>
    %83 = arith.mulf %77, %81 : vector<8x32xf32>
    %84 = arith.addf %82, %83 : vector<8x32xf32>
    %85 = math.tanh %84 : vector<8x32xf32>
    %86 = arith.mulf %79, %85 : vector<8x32xf32>
    %c24 = arith.constant 24 : index
    %c0_26 = arith.constant 0 : index
    %87 = vector.load %arg14[%c24, %c0_26] : memref<64x32xf32, #tpu.memory_space<vmem>>, vector<8x32xf32>
    tpu.vector_store %arg14[%c24, %c0_26], %86 {strides = array<i32>} : memref<64x32xf32, #tpu.memory_space<vmem>>, vector<8x32xf32>,
    %88 = vector.extract_strided_slice %6 {offsets = [32, 0], sizes = [8, 128], strides = [1, 1]} : vector<64x128xf32> to vector<8x128xf32>
    %cst_27 = arith.constant dense<0.000000e+00> : vector<8x128xf32>
    %89 = tpu.matmul %86, %7, %cst_27 {dimension_numbers = #tpu.dot_dimension_numbers<[1], [0], [0], [1], [0, 0, 1, 1], [], []>} : vector<8x32xf32>, vector<32x128xf32>, vector<8x128xf32> -> vector<8x128xf32>
    %90 = arith.addf %88, %89 : vector<8x128xf32>
    %91 = arith.negf %90 : vector<8x128xf32>
    %92 = math.exp %91 : vector<8x128xf32>
    %cst_28 = arith.constant 1.000000e+00 : f32
    %93 = vector.broadcast %cst_28 : f32 to vector<8x128xf32>
    %94 = arith.addf %93, %92 : vector<8x128xf32>
    %95 = arith.divf %93, %94 : vector<8x128xf32>
    %96 = vector.extract_strided_slice %95 {offsets = [0, 0], sizes = [8, 32], strides = [1, 1]} : vector<8x128xf32> to vector<8x32xf32>
    %97 = vector.extract_strided_slice %95 {offsets = [0, 32], sizes = [8, 32], strides = [1, 1]} : vector<8x128xf32> to vector<8x32xf32>
    %98 = vector.extract_strided_slice %95 {offsets = [0, 96], sizes = [8, 32], strides = [1, 1]} : vector<8x128xf32> to vector<8x32xf32>
    %99 = vector.extract_strided_slice %90 {offsets = [0, 64], sizes = [8, 32], strides = [1, 1]} : vector<8x128xf32> to vector<8x32xf32>
    %100 = math.tanh %99 : vector<8x32xf32>
    %101 = arith.mulf %97, %84 : vector<8x32xf32>
    %102 = arith.mulf %96, %100 : vector<8x32xf32>
    %103 = arith.addf %101, %102 : vector<8x32xf32>
    %104 = math.tanh %103 : vector<8x32xf32>
    %105 = arith.mulf %98, %104 : vector<8x32xf32>
    %c32 = arith.constant 32 : index
    %c0_29 = arith.constant 0 : index
    %106 = vector.load %arg14[%c32, %c0_29] : memref<64x32xf32, #tpu.memory_space<vmem>>, vector<8x32xf32>
    tpu.vector_store %arg14[%c32, %c0_29], %105 {strides = array<i32>} : memref<64x32xf32, #tpu.memory_space<vmem>>, vector<8x32xf32>,
    %107 = vector.extract_strided_slice %6 {offsets = [40, 0], sizes = [8, 128], strides = [1, 1]} : vector<64x128xf32> to vector<8x128xf32>
    %cst_30 = arith.constant dense<0.000000e+00> : vector<8x128xf32>
    %108 = tpu.matmul %105, %7, %cst_30 {dimension_numbers = #tpu.dot_dimension_numbers<[1], [0], [0], [1], [0, 0, 1, 1], [], []>} : vector<8x32xf32>, vector<32x128xf32>, vector<8x128xf32> -> vector<8x128xf32>
    %109 = arith.addf %107, %108 : vector<8x128xf32>
    %110 = arith.negf %109 : vector<8x128xf32>
    %111 = math.exp %110 : vector<8x128xf32>
    %cst_31 = arith.constant 1.000000e+00 : f32
    %112 = vector.broadcast %cst_31 : f32 to vector<8x128xf32>
    %113 = arith.addf %112, %111 : vector<8x128xf32>
    %114 = arith.divf %112, %113 : vector<8x128xf32>
    %115 = vector.extract_strided_slice %114 {offsets = [0, 0], sizes = [8, 32], strides = [1, 1]} : vector<8x128xf32> to vector<8x32xf32>
    %116 = vector.extract_strided_slice %114 {offsets = [0, 32], sizes = [8, 32], strides = [1, 1]} : vector<8x128xf32> to vector<8x32xf32>
    %117 = vector.extract_strided_slice %114 {offsets = [0, 96], sizes = [8, 32], strides = [1, 1]} : vector<8x128xf32> to vector<8x32xf32>
    %118 = vector.extract_strided_slice %109 {offsets = [0, 64], sizes = [8, 32], strides = [1, 1]} : vector<8x128xf32> to vector<8x32xf32>
    %119 = math.tanh %118 : vector<8x32xf32>
    %120 = arith.mulf %116, %103 : vector<8x32xf32>
    %121 = arith.mulf %115, %119 : vector<8x32xf32>
    %122 = arith.addf %120, %121 : vector<8x32xf32>
    %123 = math.tanh %122 : vector<8x32xf32>
    %124 = arith.mulf %117, %123 : vector<8x32xf32>
    %c40 = arith.constant 40 : index
    %c0_32 = arith.constant 0 : index
    %125 = vector.load %arg14[%c40, %c0_32] : memref<64x32xf32, #tpu.memory_space<vmem>>, vector<8x32xf32>
    tpu.vector_store %arg14[%c40, %c0_32], %124 {strides = array<i32>} : memref<64x32xf32, #tpu.memory_space<vmem>>, vector<8x32xf32>,
    %126 = vector.extract_strided_slice %6 {offsets = [48, 0], sizes = [8, 128], strides = [1, 1]} : vector<64x128xf32> to vector<8x128xf32>
    %cst_33 = arith.constant dense<0.000000e+00> : vector<8x128xf32>
    %127 = tpu.matmul %124, %7, %cst_33 {dimension_numbers = #tpu.dot_dimension_numbers<[1], [0], [0], [1], [0, 0, 1, 1], [], []>} : vector<8x32xf32>, vector<32x128xf32>, vector<8x128xf32> -> vector<8x128xf32>
    %128 = arith.addf %126, %127 : vector<8x128xf32>
    %129 = arith.negf %128 : vector<8x128xf32>
    %130 = math.exp %129 : vector<8x128xf32>
    %cst_34 = arith.constant 1.000000e+00 : f32
    %131 = vector.broadcast %cst_34 : f32 to vector<8x128xf32>
    %132 = arith.addf %131, %130 : vector<8x128xf32>
    %133 = arith.divf %131, %132 : vector<8x128xf32>
    %134 = vector.extract_strided_slice %133 {offsets = [0, 0], sizes = [8, 32], strides = [1, 1]} : vector<8x128xf32> to vector<8x32xf32>
    %135 = vector.extract_strided_slice %133 {offsets = [0, 32], sizes = [8, 32], strides = [1, 1]} : vector<8x128xf32> to vector<8x32xf32>
    %136 = vector.extract_strided_slice %133 {offsets = [0, 96], sizes = [8, 32], strides = [1, 1]} : vector<8x128xf32> to vector<8x32xf32>
    %137 = vector.extract_strided_slice %128 {offsets = [0, 64], sizes = [8, 32], strides = [1, 1]} : vector<8x128xf32> to vector<8x32xf32>
    %138 = math.tanh %137 : vector<8x32xf32>
    %139 = arith.mulf %135, %122 : vector<8x32xf32>
    %140 = arith.mulf %134, %138 : vector<8x32xf32>
    %141 = arith.addf %139, %140 : vector<8x32xf32>
    %142 = math.tanh %141 : vector<8x32xf32>
    %143 = arith.mulf %136, %142 : vector<8x32xf32>
    %c48 = arith.constant 48 : index
    %c0_35 = arith.constant 0 : index
    %144 = vector.load %arg14[%c48, %c0_35] : memref<64x32xf32, #tpu.memory_space<vmem>>, vector<8x32xf32>
    tpu.vector_store %arg14[%c48, %c0_35], %143 {strides = array<i32>} : memref<64x32xf32, #tpu.memory_space<vmem>>, vector<8x32xf32>,
    %145 = vector.extract_strided_slice %6 {offsets = [56, 0], sizes = [8, 128], strides = [1, 1]} : vector<64x128xf32> to vector<8x128xf32>
    %cst_36 = arith.constant dense<0.000000e+00> : vector<8x128xf32>
    %146 = tpu.matmul %143, %7, %cst_36 {dimension_numbers = #tpu.dot_dimension_numbers<[1], [0], [0], [1], [0, 0, 1, 1], [], []>} : vector<8x32xf32>, vector<32x128xf32>, vector<8x128xf32> -> vector<8x128xf32>
    %147 = arith.addf %145, %146 : vector<8x128xf32>
    %148 = arith.negf %147 : vector<8x128xf32>
    %149 = math.exp %148 : vector<8x128xf32>
    %cst_37 = arith.constant 1.000000e+00 : f32
    %150 = vector.broadcast %cst_37 : f32 to vector<8x128xf32>
    %151 = arith.addf %150, %149 : vector<8x128xf32>
    %152 = arith.divf %150, %151 : vector<8x128xf32>
    %153 = vector.extract_strided_slice %152 {offsets = [0, 0], sizes = [8, 32], strides = [1, 1]} : vector<8x128xf32> to vector<8x32xf32>
    %154 = vector.extract_strided_slice %152 {offsets = [0, 32], sizes = [8, 32], strides = [1, 1]} : vector<8x128xf32> to vector<8x32xf32>
    %155 = vector.extract_strided_slice %152 {offsets = [0, 96], sizes = [8, 32], strides = [1, 1]} : vector<8x128xf32> to vector<8x32xf32>
    %156 = vector.extract_strided_slice %147 {offsets = [0, 64], sizes = [8, 32], strides = [1, 1]} : vector<8x128xf32> to vector<8x32xf32>
    %157 = math.tanh %156 : vector<8x32xf32>
    %158 = arith.mulf %154, %141 : vector<8x32xf32>
    %159 = arith.mulf %153, %157 : vector<8x32xf32>
    %160 = arith.addf %158, %159 : vector<8x32xf32>
    %161 = math.tanh %160 : vector<8x32xf32>
    %162 = arith.mulf %155, %161 : vector<8x32xf32>
    %c56 = arith.constant 56 : index
    %c0_38 = arith.constant 0 : index
    %163 = vector.load %arg14[%c56, %c0_38] : memref<64x32xf32, #tpu.memory_space<vmem>>, vector<8x32xf32>
    tpu.vector_store %arg14[%c56, %c0_38], %162 {strides = array<i32>} : memref<64x32xf32, #tpu.memory_space<vmem>>, vector<8x32xf32>,
    %c0_39 = arith.constant 0 : index
    %c0_40 = arith.constant 0 : index
    %164 = vector.load %arg14[%c0_39, %c0_40] : memref<64x32xf32, #tpu.memory_space<vmem>>, vector<64x32xf32>
    %c0_41 = arith.constant 0 : index
    %c0_42 = arith.constant 0 : index
    %165 = vector.load %arg6[%c0_41, %c0_42] : memref<32x128xf32, #tpu.memory_space<vmem>>, vector<32x128xf32>
    %cst_43 = arith.constant dense<0.000000e+00> : vector<64x128xf32>
    %166 = tpu.matmul %164, %165, %cst_43 {dimension_numbers = #tpu.dot_dimension_numbers<[1], [0], [0], [1], [0, 0, 1, 1], [], []>} : vector<64x32xf32>, vector<32x128xf32>, vector<64x128xf32> -> vector<64x128xf32>
    %c0_44 = arith.constant 0 : index
    %c0_45 = arith.constant 0 : index
    %167 = vector.load %arg8[%c0_44, %c0_45] : memref<1x128xf32, #tpu.memory_space<vmem>>, vector<1x128xf32>
    %168 = vector.broadcast %167 : vector<1x128xf32> to vector<64x128xf32>
    %169 = arith.addf %166, %168 : vector<64x128xf32>
    %c0_46 = arith.constant 0 : index
    %c0_47 = arith.constant 0 : index
    %170 = vector.load %arg7[%c0_46, %c0_47] : memref<32x128xf32, #tpu.memory_space<vmem>>, vector<32x128xf32>
    %c1 = arith.constant 1 : index
    %c0_48 = arith.constant 0 : index
    %c0_49 = arith.constant 0 : index
    %171 = vector.load %arg1[%c1, %c0_48, %c0_49] : memref<2x8x32xf32, #tpu.memory_space<vmem>>, vector<1x8x32xf32>
    %172 = vector.shape_cast %171 : vector<1x8x32xf32> to vector<8x32xf32>
    %c1_50 = arith.constant 1 : index
    %c0_51 = arith.constant 0 : index
    %c0_52 = arith.constant 0 : index
    %173 = vector.load %arg2[%c1_50, %c0_51, %c0_52] : memref<2x8x32xf32, #tpu.memory_space<vmem>>, vector<1x8x32xf32>
    %174 = vector.shape_cast %173 : vector<1x8x32xf32> to vector<8x32xf32>
    %175 = vector.extract_strided_slice %169 {offsets = [0, 0], sizes = [8, 128], strides = [1, 1]} : vector<64x128xf32> to vector<8x128xf32>
    %cst_53 = arith.constant dense<0.000000e+00> : vector<8x128xf32>
    %176 = tpu.matmul %172, %170, %cst_53 {dimension_numbers = #tpu.dot_dimension_numbers<[1], [0], [0], [1], [0, 0, 1, 1], [], []>} : vector<8x32xf32>, vector<32x128xf32>, vector<8x128xf32> -> vector<8x128xf32>
    %177 = arith.addf %175, %176 : vector<8x128xf32>
    %178 = arith.negf %177 : vector<8x128xf32>
    %179 = math.exp %178 : vector<8x128xf32>
    %cst_54 = arith.constant 1.000000e+00 : f32
    %180 = vector.broadcast %cst_54 : f32 to vector<8x128xf32>
    %181 = arith.addf %180, %179 : vector<8x128xf32>
    %182 = arith.divf %180, %181 : vector<8x128xf32>
    %183 = vector.extract_strided_slice %182 {offsets = [0, 0], sizes = [8, 32], strides = [1, 1]} : vector<8x128xf32> to vector<8x32xf32>
    %184 = vector.extract_strided_slice %182 {offsets = [0, 32], sizes = [8, 32], strides = [1, 1]} : vector<8x128xf32> to vector<8x32xf32>
    %185 = vector.extract_strided_slice %182 {offsets = [0, 96], sizes = [8, 32], strides = [1, 1]} : vector<8x128xf32> to vector<8x32xf32>
    %186 = vector.extract_strided_slice %177 {offsets = [0, 64], sizes = [8, 32], strides = [1, 1]} : vector<8x128xf32> to vector<8x32xf32>
    %187 = math.tanh %186 : vector<8x32xf32>
    %188 = arith.mulf %184, %174 : vector<8x32xf32>
    %189 = arith.mulf %183, %187 : vector<8x32xf32>
    %190 = arith.addf %188, %189 : vector<8x32xf32>
    %191 = math.tanh %190 : vector<8x32xf32>
    %192 = arith.mulf %185, %191 : vector<8x32xf32>
    %c0_55 = arith.constant 0 : index
    %c0_56 = arith.constant 0 : index
    %193 = vector.load %arg9[%c0_55, %c0_56] : memref<256x160xf32, #tpu.memory_space<vmem>>, vector<32x160xf32>
    %cst_57 = arith.constant dense<0.000000e+00> : vector<8x160xf32>
    %194 = tpu.matmul %192, %193, %cst_57 {dimension_numbers = #tpu.dot_dimension_numbers<[1], [0], [0], [1], [0, 0, 1, 1], [], []>} : vector<8x32xf32>, vector<32x160xf32>, vector<8x160xf32> -> vector<8x160xf32>
    %195 = arith.addf %0, %194 : vector<8x160xf32>
    %196 = vector.extract_strided_slice %169 {offsets = [8, 0], sizes = [8, 128], strides = [1, 1]} : vector<64x128xf32> to vector<8x128xf32>
    %cst_58 = arith.constant dense<0.000000e+00> : vector<8x128xf32>
    %197 = tpu.matmul %192, %170, %cst_58 {dimension_numbers = #tpu.dot_dimension_numbers<[1], [0], [0], [1], [0, 0, 1, 1], [], []>} : vector<8x32xf32>, vector<32x128xf32>, vector<8x128xf32> -> vector<8x128xf32>
    %198 = arith.addf %196, %197 : vector<8x128xf32>
    %199 = arith.negf %198 : vector<8x128xf32>
    %200 = math.exp %199 : vector<8x128xf32>
    %cst_59 = arith.constant 1.000000e+00 : f32
    %201 = vector.broadcast %cst_59 : f32 to vector<8x128xf32>
    %202 = arith.addf %201, %200 : vector<8x128xf32>
    %203 = arith.divf %201, %202 : vector<8x128xf32>
    %204 = vector.extract_strided_slice %203 {offsets = [0, 0], sizes = [8, 32], strides = [1, 1]} : vector<8x128xf32> to vector<8x32xf32>
    %205 = vector.extract_strided_slice %203 {offsets = [0, 32], sizes = [8, 32], strides = [1, 1]} : vector<8x128xf32> to vector<8x32xf32>
    %206 = vector.extract_strided_slice %203 {offsets = [0, 96], sizes = [8, 32], strides = [1, 1]} : vector<8x128xf32> to vector<8x32xf32>
    %207 = vector.extract_strided_slice %198 {offsets = [0, 64], sizes = [8, 32], strides = [1, 1]} : vector<8x128xf32> to vector<8x32xf32>
    %208 = math.tanh %207 : vector<8x32xf32>
    %209 = arith.mulf %205, %190 : vector<8x32xf32>
    %210 = arith.mulf %204, %208 : vector<8x32xf32>
    %211 = arith.addf %209, %210 : vector<8x32xf32>
    %212 = math.tanh %211 : vector<8x32xf32>
    %213 = arith.mulf %206, %212 : vector<8x32xf32>
    %c32_60 = arith.constant 32 : index
    %c0_61 = arith.constant 0 : index
    %214 = vector.load %arg9[%c32_60, %c0_61] : memref<256x160xf32, #tpu.memory_space<vmem>>, vector<32x160xf32>
    %cst_62 = arith.constant dense<0.000000e+00> : vector<8x160xf32>
    %215 = tpu.matmul %213, %214, %cst_62 {dimension_numbers = #tpu.dot_dimension_numbers<[1], [0], [0], [1], [0, 0, 1, 1], [], []>} : vector<8x32xf32>, vector<32x160xf32>, vector<8x160xf32> -> vector<8x160xf32>
    %216 = arith.addf %195, %215 : vector<8x160xf32>
    %217 = vector.extract_strided_slice %169 {offsets = [16, 0], sizes = [8, 128], strides = [1, 1]} : vector<64x128xf32> to vector<8x128xf32>
    %cst_63 = arith.constant dense<0.000000e+00> : vector<8x128xf32>
    %218 = tpu.matmul %213, %170, %cst_63 {dimension_numbers = #tpu.dot_dimension_numbers<[1], [0], [0], [1], [0, 0, 1, 1], [], []>} : vector<8x32xf32>, vector<32x128xf32>, vector<8x128xf32> -> vector<8x128xf32>
    %219 = arith.addf %217, %218 : vector<8x128xf32>
    %220 = arith.negf %219 : vector<8x128xf32>
    %221 = math.exp %220 : vector<8x128xf32>
    %cst_64 = arith.constant 1.000000e+00 : f32
    %222 = vector.broadcast %cst_64 : f32 to vector<8x128xf32>
    %223 = arith.addf %222, %221 : vector<8x128xf32>
    %224 = arith.divf %222, %223 : vector<8x128xf32>
    %225 = vector.extract_strided_slice %224 {offsets = [0, 0], sizes = [8, 32], strides = [1, 1]} : vector<8x128xf32> to vector<8x32xf32>
    %226 = vector.extract_strided_slice %224 {offsets = [0, 32], sizes = [8, 32], strides = [1, 1]} : vector<8x128xf32> to vector<8x32xf32>
    %227 = vector.extract_strided_slice %224 {offsets = [0, 96], sizes = [8, 32], strides = [1, 1]} : vector<8x128xf32> to vector<8x32xf32>
    %228 = vector.extract_strided_slice %219 {offsets = [0, 64], sizes = [8, 32], strides = [1, 1]} : vector<8x128xf32> to vector<8x32xf32>
    %229 = math.tanh %228 : vector<8x32xf32>
    %230 = arith.mulf %226, %211 : vector<8x32xf32>
    %231 = arith.mulf %225, %229 : vector<8x32xf32>
    %232 = arith.addf %230, %231 : vector<8x32xf32>
    %233 = math.tanh %232 : vector<8x32xf32>
    %234 = arith.mulf %227, %233 : vector<8x32xf32>
    %c64 = arith.constant 64 : index
    %c0_65 = arith.constant 0 : index
    %235 = vector.load %arg9[%c64, %c0_65] : memref<256x160xf32, #tpu.memory_space<vmem>>, vector<32x160xf32>
    %cst_66 = arith.constant dense<0.000000e+00> : vector<8x160xf32>
    %236 = tpu.matmul %234, %235, %cst_66 {dimension_numbers = #tpu.dot_dimension_numbers<[1], [0], [0], [1], [0, 0, 1, 1], [], []>} : vector<8x32xf32>, vector<32x160xf32>, vector<8x160xf32> -> vector<8x160xf32>
    %237 = arith.addf %216, %236 : vector<8x160xf32>
    %238 = vector.extract_strided_slice %169 {offsets = [24, 0], sizes = [8, 128], strides = [1, 1]} : vector<64x128xf32> to vector<8x128xf32>
    %cst_67 = arith.constant dense<0.000000e+00> : vector<8x128xf32>
    %239 = tpu.matmul %234, %170, %cst_67 {dimension_numbers = #tpu.dot_dimension_numbers<[1], [0], [0], [1], [0, 0, 1, 1], [], []>} : vector<8x32xf32>, vector<32x128xf32>, vector<8x128xf32> -> vector<8x128xf32>
    %240 = arith.addf %238, %239 : vector<8x128xf32>
    %241 = arith.negf %240 : vector<8x128xf32>
    %242 = math.exp %241 : vector<8x128xf32>
    %cst_68 = arith.constant 1.000000e+00 : f32
    %243 = vector.broadcast %cst_68 : f32 to vector<8x128xf32>
    %244 = arith.addf %243, %242 : vector<8x128xf32>
    %245 = arith.divf %243, %244 : vector<8x128xf32>
    %246 = vector.extract_strided_slice %245 {offsets = [0, 0], sizes = [8, 32], strides = [1, 1]} : vector<8x128xf32> to vector<8x32xf32>
    %247 = vector.extract_strided_slice %245 {offsets = [0, 32], sizes = [8, 32], strides = [1, 1]} : vector<8x128xf32> to vector<8x32xf32>
    %248 = vector.extract_strided_slice %245 {offsets = [0, 96], sizes = [8, 32], strides = [1, 1]} : vector<8x128xf32> to vector<8x32xf32>
    %249 = vector.extract_strided_slice %240 {offsets = [0, 64], sizes = [8, 32], strides = [1, 1]} : vector<8x128xf32> to vector<8x32xf32>
    %250 = math.tanh %249 : vector<8x32xf32>
    %251 = arith.mulf %247, %232 : vector<8x32xf32>
    %252 = arith.mulf %246, %250 : vector<8x32xf32>
    %253 = arith.addf %251, %252 : vector<8x32xf32>
    %254 = math.tanh %253 : vector<8x32xf32>
    %255 = arith.mulf %248, %254 : vector<8x32xf32>
    %c96 = arith.constant 96 : index
    %c0_69 = arith.constant 0 : index
    %256 = vector.load %arg9[%c96, %c0_69] : memref<256x160xf32, #tpu.memory_space<vmem>>, vector<32x160xf32>
    %cst_70 = arith.constant dense<0.000000e+00> : vector<8x160xf32>
    %257 = tpu.matmul %255, %256, %cst_70 {dimension_numbers = #tpu.dot_dimension_numbers<[1], [0], [0], [1], [0, 0, 1, 1], [], []>} : vector<8x32xf32>, vector<32x160xf32>, vector<8x160xf32> -> vector<8x160xf32>
    %258 = arith.addf %237, %257 : vector<8x160xf32>
    %259 = vector.extract_strided_slice %169 {offsets = [32, 0], sizes = [8, 128], strides = [1, 1]} : vector<64x128xf32> to vector<8x128xf32>
    %cst_71 = arith.constant dense<0.000000e+00> : vector<8x128xf32>
    %260 = tpu.matmul %255, %170, %cst_71 {dimension_numbers = #tpu.dot_dimension_numbers<[1], [0], [0], [1], [0, 0, 1, 1], [], []>} : vector<8x32xf32>, vector<32x128xf32>, vector<8x128xf32> -> vector<8x128xf32>
    %261 = arith.addf %259, %260 : vector<8x128xf32>
    %262 = arith.negf %261 : vector<8x128xf32>
    %263 = math.exp %262 : vector<8x128xf32>
    %cst_72 = arith.constant 1.000000e+00 : f32
    %264 = vector.broadcast %cst_72 : f32 to vector<8x128xf32>
    %265 = arith.addf %264, %263 : vector<8x128xf32>
    %266 = arith.divf %264, %265 : vector<8x128xf32>
    %267 = vector.extract_strided_slice %266 {offsets = [0, 0], sizes = [8, 32], strides = [1, 1]} : vector<8x128xf32> to vector<8x32xf32>
    %268 = vector.extract_strided_slice %266 {offsets = [0, 32], sizes = [8, 32], strides = [1, 1]} : vector<8x128xf32> to vector<8x32xf32>
    %269 = vector.extract_strided_slice %266 {offsets = [0, 96], sizes = [8, 32], strides = [1, 1]} : vector<8x128xf32> to vector<8x32xf32>
    %270 = vector.extract_strided_slice %261 {offsets = [0, 64], sizes = [8, 32], strides = [1, 1]} : vector<8x128xf32> to vector<8x32xf32>
    %271 = math.tanh %270 : vector<8x32xf32>
    %272 = arith.mulf %268, %253 : vector<8x32xf32>
    %273 = arith.mulf %267, %271 : vector<8x32xf32>
    %274 = arith.addf %272, %273 : vector<8x32xf32>
    %275 = math.tanh %274 : vector<8x32xf32>
    %276 = arith.mulf %269, %275 : vector<8x32xf32>
    %c128 = arith.constant 128 : index
    %c0_73 = arith.constant 0 : index
    %277 = vector.load %arg9[%c128, %c0_73] : memref<256x160xf32, #tpu.memory_space<vmem>>, vector<32x160xf32>
    %cst_74 = arith.constant dense<0.000000e+00> : vector<8x160xf32>
    %278 = tpu.matmul %276, %277, %cst_74 {dimension_numbers = #tpu.dot_dimension_numbers<[1], [0], [0], [1], [0, 0, 1, 1], [], []>} : vector<8x32xf32>, vector<32x160xf32>, vector<8x160xf32> -> vector<8x160xf32>
    %279 = arith.addf %258, %278 : vector<8x160xf32>
    %280 = vector.extract_strided_slice %169 {offsets = [40, 0], sizes = [8, 128], strides = [1, 1]} : vector<64x128xf32> to vector<8x128xf32>
    %cst_75 = arith.constant dense<0.000000e+00> : vector<8x128xf32>
    %281 = tpu.matmul %276, %170, %cst_75 {dimension_numbers = #tpu.dot_dimension_numbers<[1], [0], [0], [1], [0, 0, 1, 1], [], []>} : vector<8x32xf32>, vector<32x128xf32>, vector<8x128xf32> -> vector<8x128xf32>
    %282 = arith.addf %280, %281 : vector<8x128xf32>
    %283 = arith.negf %282 : vector<8x128xf32>
    %284 = math.exp %283 : vector<8x128xf32>
    %cst_76 = arith.constant 1.000000e+00 : f32
    %285 = vector.broadcast %cst_76 : f32 to vector<8x128xf32>
    %286 = arith.addf %285, %284 : vector<8x128xf32>
    %287 = arith.divf %285, %286 : vector<8x128xf32>
    %288 = vector.extract_strided_slice %287 {offsets = [0, 0], sizes = [8, 32], strides = [1, 1]} : vector<8x128xf32> to vector<8x32xf32>
    %289 = vector.extract_strided_slice %287 {offsets = [0, 32], sizes = [8, 32], strides = [1, 1]} : vector<8x128xf32> to vector<8x32xf32>
    %290 = vector.extract_strided_slice %287 {offsets = [0, 96], sizes = [8, 32], strides = [1, 1]} : vector<8x128xf32> to vector<8x32xf32>
    %291 = vector.extract_strided_slice %282 {offsets = [0, 64], sizes = [8, 32], strides = [1, 1]} : vector<8x128xf32> to vector<8x32xf32>
    %292 = math.tanh %291 : vector<8x32xf32>
    %293 = arith.mulf %289, %274 : vector<8x32xf32>
    %294 = arith.mulf %288, %292 : vector<8x32xf32>
    %295 = arith.addf %293, %294 : vector<8x32xf32>
    %296 = math.tanh %295 : vector<8x32xf32>
    %297 = arith.mulf %290, %296 : vector<8x32xf32>
    %c160 = arith.constant 160 : index
    %c0_77 = arith.constant 0 : index
    %298 = vector.load %arg9[%c160, %c0_77] : memref<256x160xf32, #tpu.memory_space<vmem>>, vector<32x160xf32>
    %cst_78 = arith.constant dense<0.000000e+00> : vector<8x160xf32>
    %299 = tpu.matmul %297, %298, %cst_78 {dimension_numbers = #tpu.dot_dimension_numbers<[1], [0], [0], [1], [0, 0, 1, 1], [], []>} : vector<8x32xf32>, vector<32x160xf32>, vector<8x160xf32> -> vector<8x160xf32>
    %300 = arith.addf %279, %299 : vector<8x160xf32>
    %301 = vector.extract_strided_slice %169 {offsets = [48, 0], sizes = [8, 128], strides = [1, 1]} : vector<64x128xf32> to vector<8x128xf32>
    %cst_79 = arith.constant dense<0.000000e+00> : vector<8x128xf32>
    %302 = tpu.matmul %297, %170, %cst_79 {dimension_numbers = #tpu.dot_dimension_numbers<[1], [0], [0], [1], [0, 0, 1, 1], [], []>} : vector<8x32xf32>, vector<32x128xf32>, vector<8x128xf32> -> vector<8x128xf32>
    %303 = arith.addf %301, %302 : vector<8x128xf32>
    %304 = arith.negf %303 : vector<8x128xf32>
    %305 = math.exp %304 : vector<8x128xf32>
    %cst_80 = arith.constant 1.000000e+00 : f32
    %306 = vector.broadcast %cst_80 : f32 to vector<8x128xf32>
    %307 = arith.addf %306, %305 : vector<8x128xf32>
    %308 = arith.divf %306, %307 : vector<8x128xf32>
    %309 = vector.extract_strided_slice %308 {offsets = [0, 0], sizes = [8, 32], strides = [1, 1]} : vector<8x128xf32> to vector<8x32xf32>
    %310 = vector.extract_strided_slice %308 {offsets = [0, 32], sizes = [8, 32], strides = [1, 1]} : vector<8x128xf32> to vector<8x32xf32>
    %311 = vector.extract_strided_slice %308 {offsets = [0, 96], sizes = [8, 32], strides = [1, 1]} : vector<8x128xf32> to vector<8x32xf32>
    %312 = vector.extract_strided_slice %303 {offsets = [0, 64], sizes = [8, 32], strides = [1, 1]} : vector<8x128xf32> to vector<8x32xf32>
    %313 = math.tanh %312 : vector<8x32xf32>
    %314 = arith.mulf %310, %295 : vector<8x32xf32>
    %315 = arith.mulf %309, %313 : vector<8x32xf32>
    %316 = arith.addf %314, %315 : vector<8x32xf32>
    %317 = math.tanh %316 : vector<8x32xf32>
    %318 = arith.mulf %311, %317 : vector<8x32xf32>
    %c192 = arith.constant 192 : index
    %c0_81 = arith.constant 0 : index
    %319 = vector.load %arg9[%c192, %c0_81] : memref<256x160xf32, #tpu.memory_space<vmem>>, vector<32x160xf32>
    %cst_82 = arith.constant dense<0.000000e+00> : vector<8x160xf32>
    %320 = tpu.matmul %318, %319, %cst_82 {dimension_numbers = #tpu.dot_dimension_numbers<[1], [0], [0], [1], [0, 0, 1, 1], [], []>} : vector<8x32xf32>, vector<32x160xf32>, vector<8x160xf32> -> vector<8x160xf32>
    %321 = arith.addf %300, %320 : vector<8x160xf32>
    %322 = vector.extract_strided_slice %169 {offsets = [56, 0], sizes = [8, 128], strides = [1, 1]} : vector<64x128xf32> to vector<8x128xf32>
    %cst_83 = arith.constant dense<0.000000e+00> : vector<8x128xf32>
    %323 = tpu.matmul %318, %170, %cst_83 {dimension_numbers = #tpu.dot_dimension_numbers<[1], [0], [0], [1], [0, 0, 1, 1], [], []>} : vector<8x32xf32>, vector<32x128xf32>, vector<8x128xf32> -> vector<8x128xf32>
    %324 = arith.addf %322, %323 : vector<8x128xf32>
    %325 = arith.negf %324 : vector<8x128xf32>
    %326 = math.exp %325 : vector<8x128xf32>
    %cst_84 = arith.constant 1.000000e+00 : f32
    %327 = vector.broadcast %cst_84 : f32 to vector<8x128xf32>
    %328 = arith.addf %327, %326 : vector<8x128xf32>
    %329 = arith.divf %327, %328 : vector<8x128xf32>
    %330 = vector.extract_strided_slice %329 {offsets = [0, 0], sizes = [8, 32], strides = [1, 1]} : vector<8x128xf32> to vector<8x32xf32>
    %331 = vector.extract_strided_slice %329 {offsets = [0, 32], sizes = [8, 32], strides = [1, 1]} : vector<8x128xf32> to vector<8x32xf32>
    %332 = vector.extract_strided_slice %329 {offsets = [0, 96], sizes = [8, 32], strides = [1, 1]} : vector<8x128xf32> to vector<8x32xf32>
    %333 = vector.extract_strided_slice %324 {offsets = [0, 64], sizes = [8, 32], strides = [1, 1]} : vector<8x128xf32> to vector<8x32xf32>
    %334 = math.tanh %333 : vector<8x32xf32>
    %335 = arith.mulf %331, %316 : vector<8x32xf32>
    %336 = arith.mulf %330, %334 : vector<8x32xf32>
    %337 = arith.addf %335, %336 : vector<8x32xf32>
    %338 = math.tanh %337 : vector<8x32xf32>
    %339 = arith.mulf %332, %338 : vector<8x32xf32>
    %c224 = arith.constant 224 : index
    %c0_85 = arith.constant 0 : index
    %340 = vector.load %arg9[%c224, %c0_85] : memref<256x160xf32, #tpu.memory_space<vmem>>, vector<32x160xf32>
    %cst_86 = arith.constant dense<0.000000e+00> : vector<8x160xf32>
    %341 = tpu.matmul %339, %340, %cst_86 {dimension_numbers = #tpu.dot_dimension_numbers<[1], [0], [0], [1], [0, 0, 1, 1], [], []>} : vector<8x32xf32>, vector<32x160xf32>, vector<8x160xf32> -> vector<8x160xf32>
    %342 = arith.addf %321, %341 : vector<8x160xf32>
    %c0_87 = arith.constant 0 : index
    %c0_88 = arith.constant 0 : index
    %343 = vector.load %arg10[%c0_87, %c0_88] : memref<1x160xf32, #tpu.memory_space<vmem>>, vector<1x160xf32>
    %344 = vector.broadcast %343 : vector<1x160xf32> to vector<8x160xf32>
    %345 = arith.addf %342, %344 : vector<8x160xf32>
    %cst_89 = arith.constant 0.000000e+00 : f32
    %346 = vector.broadcast %cst_89 : f32 to vector<8x160xf32>
    %347 = arith.maximumf %345, %346 : vector<8x160xf32>
    %c0_90 = arith.constant 0 : index
    %c0_91 = arith.constant 0 : index
    %348 = vector.load %arg11[%c0_90, %c0_91] : memref<160x2xf32, #tpu.memory_space<vmem>>, vector<160x2xf32>
    %cst_92 = arith.constant dense<0.000000e+00> : vector<8x2xf32>
    %349 = tpu.matmul %347, %348, %cst_92 {dimension_numbers = #tpu.dot_dimension_numbers<[1], [0], [0], [1], [0, 0, 1, 1], [], []>} : vector<8x160xf32>, vector<160x2xf32>, vector<8x2xf32> -> vector<8x2xf32>
    %c0_93 = arith.constant 0 : index
    %c0_94 = arith.constant 0 : index
    %350 = vector.load %arg12[%c0_93, %c0_94] : memref<1x2xf32, #tpu.memory_space<vmem>>, vector<1x2xf32>
    %351 = vector.broadcast %350 : vector<1x2xf32> to vector<8x2xf32>
    %352 = arith.addf %349, %351 : vector<8x2xf32>
    %cst_95 = arith.constant 0.000000e+00 : f32
    %353 = vector.broadcast %cst_95 : f32 to vector<8x2xf32>
    %354 = arith.maximumf %352, %353 : vector<8x2xf32>
    %c0_96 = arith.constant 0 : index
    %c0_97 = arith.constant 0 : index
    %355 = vector.load %arg13[%c0_96, %c0_97] : memref<8x2xf32, #tpu.memory_space<vmem>>, vector<8x2xf32>
    tpu.vector_store %arg13[%c0_96, %c0_97], %354 {strides = array<i32>} : memref<8x2xf32, #tpu.memory_space<vmem>>, vector<8x2xf32>,
    return
  }
}

</mosaic_0001>

<bundles_post_ra>
// kernel: lstm_forward.1
= control target key start
LH: loop header
LB: loop body
LE: loop exit
PB: predicated region body
PF: predicated region fallthrough
CT: control target
= control target key end

     0   :  { %vm57_vm0 = vcmask 64512   ;;  %vm129_vm1 = vcmask 261120   ;;  %s1938_s22 = smov 64   ;;  %s1939_s25 = smov 32   ;;  %s2646_s4 = inlined_call_operand.vmem [shape: f32[32,128], index: 4, kind: input, shape index: {}]   ;;  %s2647_s3 = inlined_call_operand.vmem [shape: f32[8,128], index: 3, kind: input, shape index: {}]   ;;  %s2648_s0 = inlined_call_operand.vmem [shape: f32[64,8], index: 0, kind: input, shape index: {}]   ;;  %s2649_s5 = inlined_call_operand.vmem [shape: f32[1,128], index: 5, kind: input, shape index: {}]   ;;  %s2650_s1 = inlined_call_operand.vmem [shape: f32[2,8,32], index: 1, kind: input, shape index: {}]   ;;  %s2651_s2 = inlined_call_operand.vmem [shape: f32[2,8,32], index: 2, kind: input, shape index: {}]   ;;  %s2652_s6 = inlined_call_operand.vmem [shape: f32[32,128], index: 6, kind: input, shape index: {}]   ;;  %s2653_s8 = inlined_call_operand.vmem [shape: f32[1,128], index: 8, kind: input, shape index: {}]   ;;  %s2654_s7 = inlined_call_operand.vmem [shape: f32[32,128], index: 7, kind: input, shape index: {}]   ;;  %s2655_s9 = inlined_call_operand.vmem [shape: f32[256,160], index: 9, kind: input, shape index: {}]   ;;  %s2656_s11 = inlined_call_operand.vmem [shape: f32[160,2], index: 11, kind: input, shape index: {}]   ;;  %s2657_s12 = inlined_call_operand.vmem [shape: f32[1,2], index: 12, kind: input, shape index: {}]   ;;  %s2658_s10 = inlined_call_operand.vmem [shape: f32[1,160], index: 10, kind: input, shape index: {}]   ;;  %s2659_s13 = inlined_call_operand.vmem [shape: f32[8,2], index: 13, kind: output, shape index: {}]  }
   0x1   :  { %v2013_v0 = vld [vmem:[%s2646_s4 + $0x18] sm:$0xff]  ;;  %v2018_v1 = vld [vmem:[%s2646_s4 + $0x10] sm:$0xff]  ;;  %v52_v2 = vld [vmem:[%s2647_s3] sm:$0xff] }
   0x2   :  { %145 = vmatpush.msra.mxu1 %v2013_v0  ;;  %97 = vmatpush.msra.mxu0 %v52_v2  ;;  %v44_v3 = vld [vmem:[%s2648_s0] sm:$0xff]  ;;  %v2030_v4 = vld [vmem:[%s2646_s4 + $0x8] sm:$0xff]  ;;  %v50_v34 = vld [vmem:[%s2648_s0 + $0x30] sm:$0xff] }
   0x3   :  { %1735 = vmatmul.msk.f32.vlgmr.msra.gmra.mxu0 %vm57_vm0, %v44_v3  ;;  %1802 = vmatpush.msra.mxu2 %v52_v2  ;;  %v2038_v5 = vld [vmem:[%s2646_s4] sm:$0xff]  ;;  %v51_v35 = vld [vmem:[%s2648_s0 + $0x38] sm:$0xff]  ;;  %v45_v38 = vld [vmem:[%s2648_s0 + $0x8] sm:$0xff] }
   0x4   :  { %146 = vmatpush.msra.mxu1 %v2018_v1  ;;  %279 = vmatpush.msra.mxu3 %v2013_v0  ;;  %v127_v6 = vld [vmem:[%s2650_s1] sm:$0xff] }
   0x5   :  { %214 = vmatpush.msrb.mxu2 %v2013_v0  ;;  %v2068_v7 = vld [vmem:[%s2649_s5] ss:$0 sm:$0xff] }
   0x6   :  { %147 = vmatpush.msra.mxu1 %v2030_v4  ;;  %280 = vmatpush.msra.mxu3 %v2018_v1  ;;  %v128_v13 = vld [vmem:[%s2651_s2] sm:$0xff] }
   0x7   :  { %215 = vmatpush.msrb.mxu2 %v2018_v1 }
   0x8   :  { %148 = vmatpush.msra.mxu1 %v2038_v5  ;;  %281 = vmatpush.msra.mxu3 %v2030_v4 }
   0x9   :  { %216 = vmatpush.msrb.mxu2 %v2030_v4  ;;  %1743 = vmatmul.msk.f32.vlgmr.msra.gmra.mxu1 %vm129_vm1, %v127_v6 }
   0xa   :  { %344 = vmatpush.msrb.mxu1 %v2013_v0  ;;  %282 = vmatpush.msra.mxu3 %v2038_v5 }
   0xb   :  { %217 = vmatpush.msrb.mxu2 %v2038_v5  ;;  %1736 = vmatmul.msk.f32.gmra.mxu0 %vm57_vm0, %v45_v38 }
   0xc   :  { %345 = vmatpush.msrb.mxu1 %v2018_v1  ;;  %474 = vmatpush.msrb.mxu3 %v2013_v0 }
   0xd   :  { %1741 = vmatmul.msk.f32.vlgmr.msra.gmra.mxu2 %vm57_vm0, %v50_v34 }
   0xe   :  { %346 = vmatpush.msrb.mxu1 %v2030_v4  ;;  %475 = vmatpush.msrb.mxu3 %v2018_v1 }
   0xf   :  { %409 = vmatpush.msra.mxu2 %v2013_v0 }
  0x10   :  { %347 = vmatpush.msrb.mxu1 %v2038_v5  ;;  %476 = vmatpush.msrb.mxu3 %v2030_v4 }
  0x11   :  { %410 = vmatpush.msra.mxu2 %v2018_v1 }
  0x12   :  { %539 = vmatpush.msra.mxu1 %v2013_v0  ;;  %477 = vmatpush.msrb.mxu3 %v2038_v5 }
  0x13   :  { %411 = vmatpush.msra.mxu2 %v2030_v4 }
  0x14   :  { %540 = vmatpush.msra.mxu1 %v2018_v1 }
  0x15   :  { %412 = vmatpush.msra.mxu2 %v2038_v5 }
  0x16   :  { %541 = vmatpush.msra.mxu1 %v2030_v4  ;;  %1742 = vmatmul.msk.f32.gmra.mxu2 %vm57_vm0, %v51_v35 }
  0x18   :  { %542 = vmatpush.msra.mxu1 %v2038_v5 }
  0x80   :  { %v99_v8 = vpop.f32.mrf.mxu0 }
  0x81   :  { %v100_v9 = vadd.f32 %v2068_v7, %v99_v8 }
  0x86   :  { %v150_v10 = vpop.f32.mrf.mxu1 }
  0x87   :  { %v153_v11 = vadd.f32 %v150_v10, %v100_v9 }
  0x88   :  { %v102_v42 = vpop.f32.mrf.mxu0 }
  0x89   :  { %1808 = vtanh.f32 %v153_v11  ;;  %v1744_v14 = vmul.f32 -1.442695, %v153_v11  ;;  %v103_v43 = vadd.f32 %v2068_v7, %v102_v42 }
  0x8b   :  { %1810 = vpow2.f32 %v1744_v14 }
  0x8f   :  { %v1809_v12 = vpop.eup %1808 }
  0x90   :  { %180 = vrot.lane.b32.xlu0 %v1809_v12, %s1938_s22  ;;  %v2101_v40 = vpop.f32.mrf.mxu2 }
  0x91   :  { %v1811_v15 = vpop.eup %1810 }
  0x92   :  { %v157_v16 = vadd.f32 1.0, %v1811_v15 }
  0x94   :  { %1812 = vrcp.f32 %v157_v16  ;;  %v169_v22 = vand.u32 2147483648, %v157_v16  ;;  %vm163_vm3 = vweird.f32 %v157_v16  ;;  %v167_v23 = vand.u32 2147483647, %v157_v16 }
  0x96   :  { %v170_v25 = vor.u32 1.1754944e-38, %v169_v22  ;;  %vm168_vm5 = vcmp.eq.f32.partialorder %v167_v23, 8.507059e+37 }
  0x98   :  { %175 = vrot.lane.b32.xlu0 %v128_v13, %s1939_s25 }
  0x99   :  { %v2103_v41 = vpop.f32.mrf.mxu2 }
  0x9a   :  { %v1813_v17 = vpop.eup %1812 }
  0x9b   :  { %v159_v18 = vmul.f32 %v1813_v17, %v157_v16  ;;  %vm164_vm2 = vweird.f32 %v1813_v17 }
  0x9c   :  { %vm165_vm4 = vmor %vm163_vm3, %vm164_vm2 }
  0x9d   :  { %v160_v19 = vsub.f32 1.0, %v159_v18 }
  0x9f   :  { %v161_v20 = vmul.f32 %v1813_v17, %v160_v19 }
  0xa1   :  { %v162_v21 = vadd.f32 %v1813_v17, %v161_v20 }
  0xa3   :  { %v166_v24 = vsel %vm165_vm4, %v1813_v17, %v162_v21 }
  0xa4   :  { %v171_v27 = vsel %vm168_vm5, %v170_v25, %v166_v24 }
 0x102   :  { %v181_v26 = vpop.permute.xlu0 %180 }
 0x103   :  { %v183_v28 = vmul.f32 %v181_v26, %v171_v27 }
 0x105   :  { %185 = vrot.lane.b32.xlu1 %v183_v28, %s1939_s25 }
 0x10a   :  { %v176_v29 = vpop.permute.xlu0 %175 }
 0x10b   :  { %v178_v30 = vmul.f32 %v176_v29, %v171_v27 }
 0x177   :  { %v186_v31 = vpop.permute.xlu1 %185 }
 0x178   :  { %v188_v32 = vadd.f32 %v186_v31, %v178_v30  ;;  %v47_v31 = vld [vmem:[%s2648_s0 + $0x18] sm:$0xff] }
 0x17a   :  { %1814 = vtanh.f32 %v188_v32 }
 0x180   :  { %v1815_v33 = vpop.eup %1814 }
 0x181   :  { %191 = vrot.lane.b32.xlu1 %v1815_v33, %s1938_s22 }
 0x1f3   :  { %v192_v36 = vpop.permute.xlu1 %191 }
 0x1f4   :  { %v194_v37 = vmul.f32 %v192_v36, %v171_v27 }
 0x1f6   :  { %196 = vrot.lane.b32.xlu2 %v194_v37, %s1939_s25 }
 0x250   :  { %v197_v39 = vpop.permute.xlu2 %196 }
 0x251   :  { %199 = vst.msk [vmem:[#allocation2] sm:$0xff] %vm129_vm1, %v197_v39  ;;  %1745 = vmatmul.msk.f32.vlgmr.msrb.gmra.mxu2 %vm129_vm1, %v197_v39 }
 0x252   :  { %604 = vmatpush.msrb.mxu2 %v2013_v0 }
 0x254   :  { %605 = vmatpush.msrb.mxu2 %v2018_v1 }
 0x256   :  { %606 = vmatpush.msrb.mxu2 %v2030_v4  ;;  %v46_v4 = vld [vmem:[%s2648_s0 + $0x10] sm:$0xff] }
 0x257   :  { %1737 = vmatmul.msk.f32.gmra.mxu0 %vm57_vm0, %v46_v4 }
 0x258   :  { %607 = vmatpush.msrb.mxu2 %v2038_v5 }
 0x25f   :  { %1738 = vmatmul.msk.f32.gmra.mxu0 %vm57_vm0, %v47_v31  ;;  %v664_v31 = vld [vmem:[%s2652_s6 + $0x8] sm:$0xff] }
 0x2d4   :  { %v219_v44 = vpop.f32.mrf.mxu2  ;;  %v105_v6 = vpop.f32.mrf.mxu0 }
 0x2d5   :  { %v222_v45 = vadd.f32 %v219_v44, %v103_v43  ;;  %v106_v8 = vadd.f32 %v2068_v7, %v105_v6 }
 0x2d7   :  { %1816 = vtanh.f32 %v222_v45  ;;  %v1746_v47 = vmul.f32 -1.442695, %v222_v45 }
 0x2d9   :  { %1818 = vpow2.f32 %v1746_v47 }
 0x2dc   :  { %v108_v35 = vpop.f32.mrf.mxu0 }
 0x2dd   :  { %v1817_v46 = vpop.eup %1816  ;;  %v109_v36 = vadd.f32 %v2068_v7, %v108_v35 }
 0x2de   :  { %245 = vrot.lane.b32.xlu2 %v1817_v46, %s1938_s22 }
 0x2df   :  { %v1819_v48 = vpop.eup %1818 }
 0x2e0   :  { %v226_v49 = vadd.f32 1.0, %v1819_v48 }
 0x2e2   :  { %1820 = vrcp.f32 %v226_v49  ;;  %v238_v55 = vand.u32 2147483648, %v226_v49  ;;  %vm232_vm7 = vweird.f32 %v226_v49  ;;  %v236_v56 = vand.u32 2147483647, %v226_v49 }
 0x2e4   :  { %v239_v58 = vor.u32 1.1754944e-38, %v238_v55  ;;  %vm237_vm9 = vcmp.eq.f32.partialorder %v236_v56, 8.507059e+37 }
 0x2e8   :  { %v1821_v50 = vpop.eup %1820 }
 0x2e9   :  { %v228_v51 = vmul.f32 %v1821_v50, %v226_v49  ;;  %vm233_vm6 = vweird.f32 %v1821_v50 }
 0x2ea   :  { %vm234_vm8 = vmor %vm232_vm7, %vm233_vm6 }
 0x2eb   :  { %v229_v52 = vsub.f32 1.0, %v228_v51 }
 0x2ed   :  { %v230_v53 = vmul.f32 %v1821_v50, %v229_v52 }
 0x2ef   :  { %v231_v54 = vadd.f32 %v1821_v50, %v230_v53 }
 0x2f1   :  { %v235_v57 = vsel %vm234_vm8, %v1821_v50, %v231_v54 }
 0x2f2   :  { %v240_v60 = vsel %vm237_vm9, %v239_v58, %v235_v57 }
 0x2f3   :  { %v243_v62 = vmul.f32 %v240_v60, %v188_v32 }
 0x338   :  { %v246_v59 = vpop.permute.xlu2 %245 }
 0x339   :  { %v248_v61 = vmul.f32 %v246_v59, %v240_v60 }
 0x33b   :  { %250 = vrot.lane.b32.xlu0 %v248_v61, %s1939_s25 }
 0x3ad   :  { %v251_v63 = vpop.permute.xlu0 %250 }
 0x3ae   :  { %v253_v0 = vadd.f32 %v251_v63, %v243_v62  ;;  %v48_v63 = vld [vmem:[%s2648_s0 + $0x20] sm:$0xff] }
 0x3af   :  { %1739 = vmatmul.msk.f32.gmra.mxu0 %vm57_vm0, %v48_v63 }
 0x3b0   :  { %1822 = vtanh.f32 %v253_v0 }
 0x3b6   :  { %v1823_v1 = vpop.eup %1822 }
 0x3b7   :  { %256 = vrot.lane.b32.xlu1 %v1823_v1, %s1938_s22 }
 0x429   :  { %v257_v2 = vpop.permute.xlu1 %256 }
 0x42a   :  { %v259_v3 = vmul.f32 %v257_v2, %v240_v60 }
 0x42c   :  { %261 = vrot.lane.b32.xlu2 %v259_v3, %s1939_s25  ;;  %v111_v1 = vpop.f32.mrf.mxu0 }
 0x42d   :  { %v112_v2 = vadd.f32 %v2068_v7, %v111_v1 }
 0x486   :  { %v262_v5 = vpop.permute.xlu2 %261 }
 0x487   :  { %264 = vst.msk [vmem:[#allocation2 + $0x8] sm:$0xff] %vm129_vm1, %v262_v5  ;;  %1747 = vmatmul.msk.f32.vlgmr.msra.gmra.mxu3 %vm129_vm1, %v262_v5 }
 0x48e   :  { %v656_v35 = vld [vmem:[#allocation2 + $0x8] sm:$0xff] }
 0x50a   :  { %v284_v9 = vpop.f32.mrf.mxu3 }
 0x50b   :  { %v287_v10 = vadd.f32 %v284_v9, %v106_v8 }
 0x50d   :  { %1824 = vtanh.f32 %v287_v10  ;;  %v1748_v12 = vmul.f32 -1.442695, %v287_v10 }
 0x50f   :  { %1826 = vpow2.f32 %v1748_v12 }
 0x513   :  { %v1825_v11 = vpop.eup %1824 }
 0x514   :  { %310 = vrot.lane.b32.xlu0 %v1825_v11, %s1938_s22 }
 0x515   :  { %v1827_v13 = vpop.eup %1826 }
 0x516   :  { %v291_v14 = vadd.f32 1.0, %v1827_v13 }
 0x518   :  { %1828 = vrcp.f32 %v291_v14  ;;  %v303_v20 = vand.u32 2147483648, %v291_v14  ;;  %vm297_vm11 = vweird.f32 %v291_v14  ;;  %v301_v21 = vand.u32 2147483647, %v291_v14 }
 0x51a   :  { %v304_v23 = vor.u32 1.1754944e-38, %v303_v20  ;;  %vm302_vm13 = vcmp.eq.f32.partialorder %v301_v21, 8.507059e+37 }
 0x51e   :  { %v1829_v15 = vpop.eup %1828 }
 0x51f   :  { %v293_v16 = vmul.f32 %v1829_v15, %v291_v14  ;;  %vm298_vm10 = vweird.f32 %v1829_v15 }
 0x520   :  { %vm299_vm12 = vmor %vm297_vm11, %vm298_vm10 }
 0x521   :  { %v294_v17 = vsub.f32 1.0, %v293_v16 }
 0x523   :  { %v295_v18 = vmul.f32 %v1829_v15, %v294_v17 }
 0x525   :  { %v296_v19 = vadd.f32 %v1829_v15, %v295_v18 }
 0x527   :  { %v300_v22 = vsel %vm299_vm12, %v1829_v15, %v296_v19 }
 0x528   :  { %v305_v25 = vsel %vm302_vm13, %v304_v23, %v300_v22 }
 0x529   :  { %v308_v27 = vmul.f32 %v305_v25, %v253_v0 }
 0x586   :  { %v311_v24 = vpop.permute.xlu0 %310 }
 0x587   :  { %v313_v26 = vmul.f32 %v311_v24, %v305_v25 }
 0x589   :  { %315 = vrot.lane.b32.xlu1 %v313_v26, %s1939_s25 }
 0x5fb   :  { %v316_v28 = vpop.permute.xlu1 %315 }
 0x5fc   :  { %v318_v29 = vadd.f32 %v316_v28, %v308_v27  ;;  %v666_v28 = vld [vmem:[%s2652_s6 + $0x18] sm:$0xff] }
 0x5fd   :  { %707 = vmatpush.msra.mxu3 %v666_v28 }
 0x5fe   :  { %1830 = vtanh.f32 %v318_v29 }
 0x604   :  { %v1831_v30 = vpop.eup %1830 }
 0x605   :  { %321 = vrot.lane.b32.xlu2 %v1831_v30, %s1938_s22  ;;  %v49_v30 = vld [vmem:[%s2648_s0 + $0x28] sm:$0xff] }
 0x606   :  { %1740 = vmatmul.msk.f32.gmra.mxu0 %vm57_vm0, %v49_v30 }
 0x65f   :  { %v322_v32 = vpop.permute.xlu2 %321 }
 0x660   :  { %v324_v33 = vmul.f32 %v322_v32, %v305_v25  ;;  %v663_v32 = vld [vmem:[%s2652_s6] sm:$0xff] }
 0x662   :  { %326 = vrot.lane.b32.xlu0 %v324_v33, %s1939_s25 }
 0x6d4   :  { %v327_v34 = vpop.permute.xlu0 %326 }
 0x6d5   :  { %329 = vst.msk [vmem:[#allocation2 + $0x10] sm:$0xff] %vm129_vm1, %v327_v34  ;;  %1749 = vmatmul.msk.f32.vlgmr.msrb.gmra.mxu1 %vm129_vm1, %v327_v34  ;;  %v655_v34 = vld [vmem:[#allocation2] sm:$0xff] }
 0x752   :  { %v349_v37 = vpop.f32.mrf.mxu1 }
 0x753   :  { %v352_v38 = vadd.f32 %v349_v37, %v109_v36  ;;  %v657_v36 = vld [vmem:[#allocation2 + $0x10] sm:$0xff] }
 0x755   :  { %1832 = vtanh.f32 %v352_v38  ;;  %v1750_v42 = vmul.f32 -1.442695, %v352_v38 }
 0x757   :  { %1834 = vpow2.f32 %v1750_v42 }
 0x75b   :  { %v1833_v39 = vpop.eup %1832 }
 0x75c   :  { %375 = vrot.lane.b32.xlu1 %v1833_v39, %s1938_s22  ;;  %v114_v39 = vpop.f32.mrf.mxu0 }
 0x75d   :  { %v1835_v43 = vpop.eup %1834  ;;  %v115_v42 = vadd.f32 %v2068_v7, %v114_v39 }
 0x75e   :  { %v356_v44 = vadd.f32 1.0, %v1835_v43 }
 0x760   :  { %1836 = vrcp.f32 %v356_v44  ;;  %v368_v50 = vand.u32 2147483648, %v356_v44  ;;  %vm362_vm15 = vweird.f32 %v356_v44  ;;  %v366_v51 = vand.u32 2147483647, %v356_v44 }
 0x762   :  { %v369_v53 = vor.u32 1.1754944e-38, %v368_v50  ;;  %vm367_vm3 = vcmp.eq.f32.partialorder %v366_v51, 8.507059e+37 }
 0x766   :  { %v1837_v45 = vpop.eup %1836 }
 0x767   :  { %v358_v46 = vmul.f32 %v1837_v45, %v356_v44  ;;  %vm363_vm14 = vweird.f32 %v1837_v45 }
 0x768   :  { %vm364_vm2 = vmor %vm362_vm15, %vm363_vm14 }
 0x769   :  { %v359_v47 = vsub.f32 1.0, %v358_v46 }
 0x76b   :  { %v360_v48 = vmul.f32 %v1837_v45, %v359_v47 }
 0x76d   :  { %v361_v49 = vadd.f32 %v1837_v45, %v360_v48 }
 0x76f   :  { %v365_v52 = vsel %vm364_vm2, %v1837_v45, %v361_v49 }
 0x770   :  { %v370_v55 = vsel %vm367_vm3, %v369_v53, %v365_v52 }
 0x771   :  { %v373_v57 = vmul.f32 %v370_v55, %v318_v29  ;;  %v665_v29 = vld [vmem:[%s2652_s6 + $0x10] sm:$0xff] }
 0x772   :  { %708 = vmatpush.msra.mxu3 %v665_v29 }
 0x774   :  { %709 = vmatpush.msra.mxu3 %v664_v31 }
 0x776   :  { %710 = vmatpush.msra.mxu3 %v663_v32 }
 0x7ce   :  { %v376_v54 = vpop.permute.xlu1 %375 }
 0x7cf   :  { %v378_v56 = vmul.f32 %v376_v54, %v370_v55 }
 0x7d1   :  { %380 = vrot.lane.b32.xlu2 %v378_v56, %s1939_s25 }
 0x82b   :  { %v381_v58 = vpop.permute.xlu2 %380 }
 0x82c   :  { %v383_v59 = vadd.f32 %v381_v58, %v373_v57 }
 0x82e   :  { %1838 = vtanh.f32 %v383_v59 }
 0x834   :  { %v1839_v60 = vpop.eup %1838 }
 0x835   :  { %386 = vrot.lane.b32.xlu0 %v1839_v60, %s1938_s22 }
 0x8a7   :  { %v387_v61 = vpop.permute.xlu0 %386 }
 0x8a8   :  { %v389_v62 = vmul.f32 %v387_v61, %v370_v55 }
 0x8aa   :  { %391 = vrot.lane.b32.xlu1 %v389_v62, %s1939_s25 }
 0x91c   :  { %v392_v0 = vpop.permute.xlu1 %391 }
 0x91d   :  { %394 = vst.msk [vmem:[#allocation2 + $0x18] sm:$0xff] %vm129_vm1, %v392_v0  ;;  %1751 = vmatmul.msk.f32.vlgmr.msra.gmra.mxu2 %vm129_vm1, %v392_v0 }
 0x924   :  { %v658_v37 = vld [vmem:[#allocation2 + $0x18] sm:$0xff] }
 0x9a0   :  { %v414_v3 = vpop.f32.mrf.mxu2 }
 0x9a1   :  { %v417_v4 = vadd.f32 %v414_v3, %v112_v2  ;;  %v2177_v3 = vld [vmem:[%s2654_s7 + $0x18] sm:$0xff] }
 0x9a2   :  { %759 = vmatpush.msrb.mxu1 %v2177_v3  ;;  %834 = vmatpush.msra.mxu2 %v2177_v3 }
 0x9a3   :  { %1840 = vtanh.f32 %v417_v4  ;;  %v1752_v6 = vmul.f32 -1.442695, %v417_v4  ;;  %v2182_v4 = vld [vmem:[%s2654_s7 + $0x10] sm:$0xff] }
 0x9a4   :  { %760 = vmatpush.msrb.mxu1 %v2182_v4  ;;  %835 = vmatpush.msra.mxu2 %v2182_v4 }
 0x9a5   :  { %1842 = vpow2.f32 %v1752_v6  ;;  %v2196_v6 = vld [vmem:[%s2654_s7] sm:$0xff] }
 0x9a9   :  { %v1841_v5 = vpop.eup %1840 }
 0x9aa   :  { %440 = vrot.lane.b32.xlu2 %v1841_v5, %s1938_s22  ;;  %v2189_v5 = vld [vmem:[%s2654_s7 + $0x8] sm:$0xff] }
 0x9ab   :  { %v1843_v8 = vpop.eup %1842  ;;  %761 = vmatpush.msrb.mxu1 %v2189_v5  ;;  %836 = vmatpush.msra.mxu2 %v2189_v5 }
 0x9ac   :  { %v421_v9 = vadd.f32 1.0, %v1843_v8 }
 0x9ad   :  { %762 = vmatpush.msrb.mxu1 %v2196_v6  ;;  %837 = vmatpush.msra.mxu2 %v2196_v6 }
 0x9ae   :  { %1844 = vrcp.f32 %v421_v9  ;;  %v433_v15 = vand.u32 2147483648, %v421_v9  ;;  %vm427_vm5 = vweird.f32 %v421_v9  ;;  %v431_v16 = vand.u32 2147483647, %v421_v9 }
 0x9b0   :  { %v434_v18 = vor.u32 1.1754944e-38, %v433_v15  ;;  %vm432_vm7 = vcmp.eq.f32.partialorder %v431_v16, 8.507059e+37 }
 0x9b4   :  { %v1845_v10 = vpop.eup %1844 }
 0x9b5   :  { %v423_v11 = vmul.f32 %v1845_v10, %v421_v9  ;;  %vm428_vm4 = vweird.f32 %v1845_v10  ;;  %v1767_v9 = vld [vmem:[%s2650_s1 + $0x8] sm:$0xff] }
 0x9b6   :  { %vm429_vm6 = vmor %vm427_vm5, %vm428_vm4 }
 0x9b7   :  { %v424_v12 = vsub.f32 1.0, %v423_v11  ;;  %v118_v11 = vadd.f32 %v2068_v7, %v2101_v40  ;;  %v1768_v7 = vld [vmem:[%s2651_s2 + $0x8] sm:$0xff] }
 0x9b9   :  { %v425_v13 = vmul.f32 %v1845_v10, %v424_v12 }
 0x9bb   :  { %v426_v14 = vadd.f32 %v1845_v10, %v425_v13 }
 0x9bd   :  { %v430_v17 = vsel %vm429_vm6, %v1845_v10, %v426_v14  ;;  %v2214_v14 = vld [vmem:[%s2653_s8] ss:$0 sm:$0xff] }
 0x9be   :  { %v435_v20 = vsel %vm432_vm7, %v434_v18, %v430_v17 }
 0x9bf   :  { %v438_v22 = vmul.f32 %v435_v20, %v383_v59 }
 0xa04   :  { %v441_v19 = vpop.permute.xlu2 %440 }
 0xa05   :  { %v443_v21 = vmul.f32 %v441_v19, %v435_v20 }
 0xa07   :  { %445 = vrot.lane.b32.xlu0 %v443_v21, %s1939_s25 }
 0xa79   :  { %v446_v23 = vpop.permute.xlu0 %445 }
 0xa7a   :  { %v448_v24 = vadd.f32 %v446_v23, %v438_v22 }
 0xa7c   :  { %1846 = vtanh.f32 %v448_v24 }
 0xa82   :  { %v1847_v25 = vpop.eup %1846 }
 0xa83   :  { %451 = vrot.lane.b32.xlu1 %v1847_v25, %s1938_s22 }
 0xaf5   :  { %v452_v26 = vpop.permute.xlu1 %451 }
 0xaf6   :  { %v454_v27 = vmul.f32 %v452_v26, %v435_v20 }
 0xaf8   :  { %456 = vrot.lane.b32.xlu2 %v454_v27, %s1939_s25 }
 0xb52   :  { %v457_v33 = vpop.permute.xlu2 %456 }
 0xb53   :  { %459 = vst.msk [vmem:[#allocation2 + $0x20] sm:$0xff] %vm129_vm1, %v457_v33  ;;  %1753 = vmatmul.msk.f32.vlgmr.msrb.gmra.mxu3 %vm129_vm1, %v457_v33 }
 0xb5a   :  { %v659_v38 = vld [vmem:[#allocation2 + $0x20] sm:$0xff] }
 0xb5b   :  { %1759 = vmatmul.msk.f32.vlgmr.msra.gmra.mxu3 %vm129_vm1, %v655_v34 }
 0xb63   :  { %1760 = vmatmul.msk.f32.gmra.mxu3 %vm129_vm1, %v656_v35 }
 0xb6b   :  { %1761 = vmatmul.msk.f32.gmra.mxu3 %vm129_vm1, %v657_v36 }
 0xb73   :  { %1762 = vmatmul.msk.f32.gmra.mxu3 %vm129_vm1, %v658_v37 }
 0xb7b   :  { %1763 = vmatmul.msk.f32.gmra.mxu3 %vm129_vm1, %v659_v38 }
 0xbd6   :  { %v479_v43 = vpop.f32.mrf.mxu3 }
 0xbd7   :  { %v482_v44 = vadd.f32 %v479_v43, %v115_v42 }
 0xbd9   :  { %1848 = vtanh.f32 %v482_v44  ;;  %v1754_v46 = vmul.f32 -1.442695, %v482_v44 }
 0xbdb   :  { %1850 = vpow2.f32 %v1754_v46 }
 0xbde   :  { %v712_v15 = vpop.f32.mrf.mxu3 }
 0xbdf   :  { %v1849_v45 = vpop.eup %1848  ;;  %v713_v16 = vadd.f32 %v2214_v14, %v712_v15 }
 0xbe0   :  { %505 = vrot.lane.b32.xlu0 %v1849_v45, %s1938_s22 }
 0xbe1   :  { %v1851_v47 = vpop.eup %1850 }
 0xbe2   :  { %v486_v48 = vadd.f32 1.0, %v1851_v47 }
 0xbe4   :  { %1852 = vrcp.f32 %v486_v48  ;;  %v498_v54 = vand.u32 2147483648, %v486_v48  ;;  %vm492_vm8 = vweird.f32 %v486_v48  ;;  %v496_v55 = vand.u32 2147483647, %v486_v48 }
 0xbe6   :  { %v499_v57 = vor.u32 1.1754944e-38, %v498_v54  ;;  %vm497_vm10 = vcmp.eq.f32.partialorder %v496_v55, 8.507059e+37 }
 0xbea   :  { %v1853_v49 = vpop.eup %1852 }
 0xbeb   :  { %v488_v50 = vmul.f32 %v1853_v49, %v486_v48  ;;  %vm493_vm0 = vweird.f32 %v1853_v49 }
 0xbec   :  { %vm494_vm9 = vmor %vm492_vm8, %vm493_vm0 }
 0xbed   :  { %v489_v51 = vsub.f32 1.0, %v488_v50 }
 0xbef   :  { %v490_v52 = vmul.f32 %v1853_v49, %v489_v51 }
 0xbf1   :  { %v491_v53 = vadd.f32 %v1853_v49, %v490_v52 }
 0xbf3   :  { %v495_v56 = vsel %vm494_vm9, %v1853_v49, %v491_v53 }
 0xbf4   :  { %v500_v59 = vsel %vm497_vm10, %v499_v57, %v495_v56 }
 0xbf5   :  { %v503_v61 = vmul.f32 %v500_v59, %v448_v24 }
 0xc52   :  { %v506_v58 = vpop.permute.xlu0 %505 }
 0xc53   :  { %v508_v60 = vmul.f32 %v506_v58, %v500_v59 }
 0xc55   :  { %510 = vrot.lane.b32.xlu1 %v508_v60, %s1939_s25 }
 0xcc7   :  { %v511_v62 = vpop.permute.xlu1 %510 }
 0xcc8   :  { %v2169_v63 = vadd.f32 %v511_v62, %v503_v61 }
 0xcca   :  { %1854 = vtanh.f32 %v2169_v63 }
 0xcd0   :  { %v1855_v0 = vpop.eup %1854 }
 0xcd1   :  { %516 = vrot.lane.b32.xlu2 %v1855_v0, %s1938_s22 }
 0xd2b   :  { %v517_v1 = vpop.permute.xlu2 %516 }
 0xd2c   :  { %v519_v2 = vmul.f32 %v517_v1, %v500_v59 }
 0xd2e   :  { %521 = vrot.lane.b32.xlu0 %v519_v2, %s1939_s25 }
 0xda0   :  { %v522_v8 = vpop.permute.xlu0 %521 }
 0xda1   :  { %524 = vst.msk [vmem:[#allocation2 + $0x28] sm:$0xff] %vm129_vm1, %v522_v8  ;;  %1755 = vmatmul.msk.f32.vlgmr.msra.gmra.mxu1 %vm129_vm1, %v522_v8 }
 0xda8   :  { %v660_v10 = vld [vmem:[#allocation2 + $0x28] sm:$0xff] }
 0xda9   :  { %1764 = vmatmul.msk.f32.gmra.mxu3 %vm129_vm1, %v660_v10  ;;  %1769 = vmatmul.msk.f32.vlgmr.msrb.gmra.mxu1 %vm129_vm1, %v1767_v9  ;;  %v715_v10 = vpop.f32.mrf.mxu3 }
 0xe1e   :  { %v544_v12 = vpop.f32.mrf.mxu1 }
 0xe1f   :  { %v547_v13 = vadd.f32 %v544_v12, %v118_v11  ;;  %v716_v11 = vadd.f32 %v2214_v14, %v715_v10 }
 0xe21   :  { %1856 = vtanh.f32 %v547_v13  ;;  %v1756_v23 = vmul.f32 -1.442695, %v547_v13 }
 0xe26   :  { %v764_v17 = vpop.f32.mrf.mxu1 }
 0xe27   :  { %v1857_v18 = vpop.eup %1856  ;;  %v767_v19 = vadd.f32 %v764_v17, %v713_v16 }
 0xe28   :  { %570 = vrot.lane.b32.xlu1 %v1857_v18, %s1938_s22 }
 0xe29   :  { %1858 = vtanh.f32 %v767_v19  ;;  %v1770_v20 = vmul.f32 -1.442695, %v767_v19 }
 0xe2b   :  { %1860 = vpow2.f32 %v1770_v20 }
 0xe2f   :  { %v1859_v40 = vpop.eup %1858 }
 0xe30   :  { %789 = vrot.lane.b32.xlu1 %v1768_v7, %s1939_s25  ;;  %794 = vrot.lane.b32.xlu2 %v1859_v40, %s1938_s22 }
 0xe31   :  { %v1861_v21 = vpop.eup %1860 }
 0xe32   :  { %v771_v22 = vadd.f32 1.0, %v1861_v21 }
 0xe34   :  { %1862 = vrcp.f32 %v771_v22  ;;  %v783_v32 = vand.u32 2147483648, %v771_v22  ;;  %vm777_vm12 = vweird.f32 %v771_v22  ;;  %v781_v33 = vand.u32 2147483647, %v771_v22 }
 0xe35   :  { %1864 = vpow2.f32 %v1756_v23 }
 0xe36   :  { %v784_v36 = vor.u32 1.1754944e-38, %v783_v32  ;;  %vm782_vm14 = vcmp.eq.f32.partialorder %v781_v33, 8.507059e+37  ;;  %v886_v33 = vld [vmem:[%s2655_s9 + $0x70] sm:$0xff] }
 0xe37   :  { %905 = vmatpush.msra.mxu1 %v886_v33 }
 0xe3a   :  { %v1863_v24 = vpop.eup %1862 }
 0xe3b   :  { %v1865_v25 = vpop.eup %1864  ;;  %v773_v26 = vmul.f32 %v1863_v24, %v771_v22  ;;  %vm778_vm11 = vweird.f32 %v1863_v24 }
 0xe3c   :  { %v551_v27 = vadd.f32 1.0, %v1865_v25  ;;  %vm779_vm13 = vmor %vm777_vm12, %vm778_vm11 }
 0xe3d   :  { %v774_v28 = vsub.f32 1.0, %v773_v26 }
 0xe3e   :  { %1866 = vrcp.f32 %v551_v27  ;;  %v563_v45 = vand.u32 2147483648, %v551_v27  ;;  %vm557_vm2 = vweird.f32 %v551_v27  ;;  %v561_v46 = vand.u32 2147483647, %v551_v27 }
 0xe3f   :  { %v775_v29 = vmul.f32 %v1863_v24, %v774_v28 }
 0xe40   :  { %v564_v48 = vor.u32 1.1754944e-38, %v563_v45  ;;  %vm562_vm4 = vcmp.eq.f32.partialorder %v561_v46, 8.507059e+37  ;;  %v815_v45 = vld [vmem:[%s2655_s9 + $0x30] sm:$0xff]  ;;  %v816_v46 = vld [vmem:[%s2655_s9 + $0x38] sm:$0xff] }
 0xe41   :  { %v776_v30 = vadd.f32 %v1863_v24, %v775_v29 }
 0xe43   :  { %v780_v34 = vsel %vm779_vm13, %v1863_v24, %v776_v30 }
 0xe44   :  { %v1867_v31 = vpop.eup %1866  ;;  %v785_v38 = vsel %vm782_vm14, %v784_v36, %v780_v34  ;;  %v887_v34 = vld [vmem:[%s2655_s9 + $0x78] sm:$0xff]  ;;  %v885_v36 = vld [vmem:[%s2655_s9 + $0x68] sm:$0xff] }
 0xe45   :  { %v553_v35 = vmul.f32 %v1867_v31, %v551_v27  ;;  %vm558_vm15 = vweird.f32 %v1867_v31 }
 0xe46   :  { %vm559_vm3 = vmor %vm557_vm2, %vm558_vm15 }
 0xe47   :  { %v554_v42 = vsub.f32 1.0, %v553_v35  ;;  %v884_v35 = vld [vmem:[%s2655_s9 + $0x60] sm:$0xff] }
 0xe48   :  { %906 = vmatpush.msra.mxu1 %v884_v35 }
 0xe49   :  { %v555_v43 = vmul.f32 %v1867_v31, %v554_v42  ;;  %v881_v42 = vld [vmem:[%s2655_s9 + $0x48] sm:$0xff] }
 0xe4b   :  { %v556_v44 = vadd.f32 %v1867_v31, %v555_v43 }
 0xe4d   :  { %v560_v47 = vsel %vm559_vm3, %v1867_v31, %v556_v44 }
 0xe4e   :  { %v565_v50 = vsel %vm562_vm4, %v564_v48, %v560_v47  ;;  %v813_v47 = vld [vmem:[%s2655_s9 + $0x20] sm:$0xff]  ;;  %v814_v48 = vld [vmem:[%s2655_s9 + $0x28] sm:$0xff] }
 0xe4f   :  { %v568_v57 = vmul.f32 %v565_v50, %v2169_v63 }
 0xe8a   :  { %v795_v37 = vpop.permute.xlu2 %794 }
 0xe8b   :  { %v797_v39 = vmul.f32 %v795_v37, %v785_v38  ;;  %v882_v37 = vld [vmem:[%s2655_s9 + $0x50] sm:$0xff] }
 0xe8c   :  { %907 = vmatpush.msra.mxu1 %v882_v37 }
 0xe8d   :  { %799 = vrot.lane.b32.xlu2 %v797_v39, %s1939_s25  ;;  %v880_v39 = vld [vmem:[%s2655_s9 + $0x40] sm:$0xff] }
 0xe8e   :  { %908 = vmatpush.msra.mxu1 %v880_v39 }
 0xe90   :  { %945 = vmatpush.msrb.mxu1 %v815_v45 }
 0xe92   :  { %946 = vmatpush.msrb.mxu1 %v813_v47 }
 0xe9a   :  { %v571_v49 = vpop.permute.xlu1 %570 }
 0xe9b   :  { %v573_v51 = vmul.f32 %v571_v49, %v565_v50  ;;  %v811_v49 = vld [vmem:[%s2655_s9 + $0x10] sm:$0xff] }
 0xe9c   :  { %947 = vmatpush.msrb.mxu1 %v811_v49 }
 0xe9d   :  { %575 = vrot.lane.b32.xlu0 %v573_v51, %s1939_s25  ;;  %v809_v51 = vld [vmem:[%s2655_s9] sm:$0xff] }
 0xe9e   :  { %948 = vmatpush.msrb.mxu1 %v809_v51 }
 0xea2   :  { %v790_v52 = vpop.permute.xlu1 %789 }
 0xea3   :  { %v792_v53 = vmul.f32 %v790_v52, %v785_v38  ;;  %v810_v52 = vld [vmem:[%s2655_s9 + $0x8] sm:$0xff] }
 0xee7   :  { %v800_v54 = vpop.permute.xlu2 %799 }
 0xee8   :  { %v802_v55 = vadd.f32 %v800_v54, %v792_v53 }
 0xeea   :  { %1868 = vtanh.f32 %v802_v55 }
 0xef0   :  { %v1869_v56 = vpop.eup %1868 }
 0xef1   :  { %805 = vrot.lane.b32.xlu1 %v1869_v56, %s1938_s22 }
 0xf0f   :  { %v576_v58 = vpop.permute.xlu0 %575 }
 0xf10   :  { %v2227_v59 = vadd.f32 %v576_v58, %v568_v57  ;;  %v718_v57 = vpop.f32.mrf.mxu3 }
 0xf11   :  { %v719_v58 = vadd.f32 %v2214_v14, %v718_v57 }
 0xf12   :  { %1870 = vtanh.f32 %v2227_v59 }
 0xf18   :  { %v1871_v60 = vpop.eup %1870 }
 0xf19   :  { %581 = vrot.lane.b32.xlu0 %v1871_v60, %s1938_s22 }
 0xf63   :  { %v806_v61 = vpop.permute.xlu1 %805 }
 0xf64   :  { %v808_v62 = vmul.f32 %v806_v61, %v785_v38  ;;  %v883_v38 = vld [vmem:[%s2655_s9 + $0x58] sm:$0xff] }
 0xf66   :  { %818 = vrot.lane.b32.xlu0 %v808_v62, %s1939_s25 }
 0xf8b   :  { %v582_v0 = vpop.permute.xlu0 %581 }
 0xf8c   :  { %v584_v1 = vmul.f32 %v582_v0, %v565_v50  ;;  %v812_v50 = vld [vmem:[%s2655_s9 + $0x18] sm:$0xff] }
 0xf8e   :  { %586 = vrot.lane.b32.xlu2 %v584_v1, %s1939_s25 }
 0xfd8   :  { %v2235_v63 = vpop.permute.xlu0 %818 }
 0xfe8   :  { %v587_v2 = vpop.permute.xlu2 %586 }
 0xfe9   :  { %589 = vst.msk [vmem:[#allocation2 + $0x30] sm:$0xff] %vm129_vm1, %v587_v2  ;;  %1757 = vmatmul.msk.f32.vlgmr.msrb.gmra.mxu2 %vm129_vm1, %v587_v2 }
 0xfea   :  { %925 = vmatpush.msrb.mxu2 %v887_v34 }
 0xfec   :  { %926 = vmatpush.msrb.mxu2 %v885_v36 }
 0xfee   :  { %927 = vmatpush.msrb.mxu2 %v883_v38  ;;  %v721_v38 = vpop.f32.mrf.mxu3 }
 0xfef   :  { %v722_v39 = vadd.f32 %v2214_v14, %v721_v38 }
 0xff0   :  { %v661_v8 = vld [vmem:[#allocation2 + $0x30] sm:$0xff]  ;;  %928 = vmatpush.msrb.mxu2 %v881_v42 }
 0xff1   :  { %1765 = vmatmul.msk.f32.gmra.mxu3 %vm129_vm1, %v661_v8  ;;  %1771 = vmatmul.msk.f32.vlgmr.msra.gmra.mxu2 %vm129_vm1, %v2235_v63 }
 0xff2   :  { %965 = vmatpush.msra.mxu2 %v816_v46 }
 0xff4   :  { %966 = vmatpush.msra.mxu2 %v814_v48 }
 0xff6   :  { %967 = vmatpush.msra.mxu2 %v812_v50 }
 0xff8   :  { %968 = vmatpush.msra.mxu2 %v810_v52 }
0x106c   :  { %v2240_v9 = vpop.f32.mrf.mxu2 }
0x1074   :  { %v839_v12 = vpop.f32.mrf.mxu2 }
0x1075   :  { %v842_v13 = vadd.f32 %v839_v12, %v716_v11 }
0x1077   :  { %1872 = vtanh.f32 %v842_v13  ;;  %v1772_v16 = vmul.f32 -1.442695, %v842_v13 }
0x1079   :  { %1874 = vpow2.f32 %v1772_v16 }
0x107d   :  { %v1873_v15 = vpop.eup %1872 }
0x107e   :  { %865 = vrot.lane.b32.xlu1 %v1873_v15, %s1938_s22 }
0x107f   :  { %v1875_v17 = vpop.eup %1874 }
0x1080   :  { %v846_v18 = vadd.f32 1.0, %v1875_v17 }
0x1082   :  { %1876 = vrcp.f32 %v846_v18  ;;  %v858_v22 = vand.u32 2147483648, %v846_v18  ;;  %vm852_vm6 = vweird.f32 %v846_v18  ;;  %v856_v23 = vand.u32 2147483647, %v846_v18 }
0x1084   :  { %v859_v25 = vor.u32 1.1754944e-38, %v858_v22  ;;  %vm857_vm0 = vcmp.eq.f32.partialorder %v856_v23, 8.507059e+37  ;;  %v1037_v23 = vld [vmem:[%s2655_s9 + $0xb0] sm:$0xff] }
0x1088   :  { %v1877_v19 = vpop.eup %1876 }
0x1089   :  { %v848_v7 = vmul.f32 %v1877_v19, %v846_v18  ;;  %vm853_vm5 = vweird.f32 %v1877_v19 }
0x108a   :  { %vm854_vm7 = vmor %vm852_vm6, %vm853_vm5 }
0x108b   :  { %v849_v40 = vsub.f32 1.0, %v848_v7 }
0x108d   :  { %v850_v20 = vmul.f32 %v1877_v19, %v849_v40 }
0x108f   :  { %v851_v21 = vadd.f32 %v1877_v19, %v850_v20 }
0x1091   :  { %v855_v24 = vsel %vm854_vm7, %v1877_v19, %v851_v21 }
0x1092   :  { %v860_v27 = vsel %vm857_vm0, %v859_v25, %v855_v24  ;;  %v1038_v24 = vld [vmem:[%s2655_s9 + $0xb8] sm:$0xff]  ;;  %v1035_v25 = vld [vmem:[%s2655_s9 + $0xa0] sm:$0xff] }
0x1093   :  { %v863_v29 = vmul.f32 %v860_v27, %v802_v55 }
0x10f0   :  { %v866_v26 = vpop.permute.xlu1 %865 }
0x10f1   :  { %v868_v28 = vmul.f32 %v866_v26, %v860_v27  ;;  %v1036_v26 = vld [vmem:[%s2655_s9 + $0xa8] sm:$0xff] }
0x10f3   :  { %870 = vrot.lane.b32.xlu2 %v868_v28, %s1939_s25  ;;  %v1034_v28 = vld [vmem:[%s2655_s9 + $0x98] sm:$0xff] }
0x114d   :  { %v871_v30 = vpop.permute.xlu2 %870 }
0x114e   :  { %v2245_v31 = vadd.f32 %v871_v30, %v863_v29  ;;  %v1031_v29 = vld [vmem:[%s2655_s9 + $0x80] sm:$0xff]  ;;  %v1032_v30 = vld [vmem:[%s2655_s9 + $0x88] sm:$0xff] }
0x1150   :  { %1878 = vtanh.f32 %v2245_v31 }
0x1156   :  { %v1879_v32 = vpop.eup %1878 }
0x1157   :  { %876 = vrot.lane.b32.xlu0 %v1879_v32, %s1938_s22 }
0x11c9   :  { %v877_v43 = vpop.permute.xlu0 %876 }
0x11ca   :  { %v879_v44 = vmul.f32 %v877_v43, %v860_v27  ;;  %v1033_v27 = vld [vmem:[%s2655_s9 + $0x90] sm:$0xff] }
0x11cc   :  { %889 = vrot.lane.b32.xlu1 %v879_v44, %s1939_s25 }
0x123e   :  { %v890_v53 = vpop.permute.xlu1 %889 }
0x123f   :  { %1773 = vmatmul.msk.f32.vlgmr.msra.gmra.mxu1 %vm129_vm1, %v890_v53  ;;  %1774 = vmatmul.msk.f32.vlgmr.msrb.gmra.mxu2 %vm129_vm1, %v890_v53 }
0x1240   :  { %985 = vmatpush.msra.mxu1 %v2177_v3  ;;  %1056 = vmatpush.msrb.mxu2 %v1037_v23 }
0x1242   :  { %986 = vmatpush.msra.mxu1 %v2182_v4  ;;  %1057 = vmatpush.msrb.mxu2 %v1035_v25 }
0x1244   :  { %987 = vmatpush.msra.mxu1 %v2189_v5  ;;  %1058 = vmatpush.msrb.mxu2 %v1033_v27 }
0x1246   :  { %988 = vmatpush.msra.mxu1 %v2196_v6  ;;  %1059 = vmatpush.msrb.mxu2 %v1031_v29 }
0x1247   :  { %1775 = vmatmul.msk.f32.vlgmr.msrb.gmra.mxu1 %vm129_vm1, %v2235_v63  ;;  %1776 = vmatmul.msk.f32.vlgmr.msra.gmra.mxu2 %vm129_vm1, %v2235_v63 }
0x1248   :  { %1076 = vmatpush.msrb.mxu1 %v1038_v24  ;;  %1098 = vmatpush.msra.mxu2 %v2177_v3 }
0x124a   :  { %1077 = vmatpush.msrb.mxu1 %v1036_v26  ;;  %1099 = vmatpush.msra.mxu2 %v2182_v4 }
0x124c   :  { %1078 = vmatpush.msrb.mxu1 %v1034_v28  ;;  %1100 = vmatpush.msra.mxu2 %v2189_v5 }
0x124e   :  { %1079 = vmatpush.msrb.mxu1 %v1032_v30  ;;  %1101 = vmatpush.msra.mxu2 %v2196_v6 }
0x124f   :  { %1777 = vmatmul.msk.f32.vlgmr.msra.gmra.mxu1 %vm129_vm1, %v890_v53 }
0x12bc   :  { %v910_v54 = vpop.f32.mrf.mxu1 }
0x12c2   :  { %v2359_v34 = vpop.f32.mrf.mxu2 }
0x12c4   :  { %v950_v55 = vpop.f32.mrf.mxu1 }
0x12c5   :  { %v2309_v56 = vadd.f32 %v950_v55, %v910_v54 }
0x12ca   :  { %v2361_v35 = vpop.f32.mrf.mxu2 }
0x12cc   :  { %v990_v60 = vpop.f32.mrf.mxu1 }
0x12cd   :  { %v993_v61 = vadd.f32 %v990_v60, %v719_v58 }
0x12cf   :  { %1880 = vtanh.f32 %v993_v61  ;;  %v1778_v0 = vmul.f32 -1.442695, %v993_v61 }
0x12d1   :  { %1882 = vpow2.f32 %v1778_v0 }
0x12d5   :  { %v1881_v62 = vpop.eup %1880 }
0x12d6   :  { %1016 = vrot.lane.b32.xlu2 %v1881_v62, %s1938_s22 }
0x12d7   :  { %v1883_v1 = vpop.eup %1882 }
0x12d8   :  { %v997_v2 = vadd.f32 1.0, %v1883_v1 }
0x12da   :  { %1884 = vrcp.f32 %v997_v2  ;;  %v1009_v13 = vand.u32 2147483648, %v997_v2  ;;  %vm1003_vm9 = vweird.f32 %v997_v2  ;;  %v1007_v15 = vand.u32 2147483647, %v997_v2 }
0x12dc   :  { %v1010_v17 = vor.u32 1.1754944e-38, %v1009_v13  ;;  %vm1008_vm11 = vcmp.eq.f32.partialorder %v1007_v15, 8.507059e+37  ;;  %v724_v15 = vpop.f32.mrf.mxu3 }
0x12e0   :  { %v1885_v63 = vpop.eup %1884 }
0x12e1   :  { %v999_v8 = vmul.f32 %v1885_v63, %v997_v2  ;;  %vm1004_vm8 = vweird.f32 %v1885_v63  ;;  %v1151_v2 = vld [vmem:[%s2655_s9 + $0xf8] sm:$0xff] }
0x12e2   :  { %vm1005_vm10 = vmor %vm1003_vm9, %vm1004_vm8  ;;  %1189 = vmatpush.msra.mxu1 %v1151_v2 }
0x12e3   :  { %v1000_v10 = vsub.f32 1.0, %v999_v8  ;;  %v1147_v8 = vld [vmem:[%s2655_s9 + $0xd8] sm:$0xff] }
0x12e5   :  { %v1001_v11 = vmul.f32 %v1885_v63, %v1000_v10  ;;  %v1145_v10 = vld [vmem:[%s2655_s9 + $0xc8] sm:$0xff] }
0x12e7   :  { %v1002_v12 = vadd.f32 %v1885_v63, %v1001_v11 }
0x12e9   :  { %v1006_v16 = vsel %vm1005_vm10, %v1885_v63, %v1002_v12  ;;  %v1149_v63 = vld [vmem:[%s2655_s9 + $0xe8] sm:$0xff] }
0x12ea   :  { %v1011_v19 = vsel %vm1008_vm11, %v1010_v17, %v1006_v16  ;;  %1190 = vmatpush.msra.mxu1 %v1149_v63  ;;  %v725_v16 = vadd.f32 %v2214_v14, %v724_v15 }
0x12eb   :  { %v1014_v40 = vmul.f32 %v1011_v19, %v2245_v31 }
0x12ec   :  { %1191 = vmatpush.msra.mxu1 %v1147_v8 }
0x12ee   :  { %1192 = vmatpush.msra.mxu1 %v1145_v10 }
0x1330   :  { %v1017_v18 = vpop.permute.xlu2 %1016 }
0x1331   :  { %v1019_v7 = vmul.f32 %v1017_v18, %v1011_v19 }
0x1333   :  { %1021 = vrot.lane.b32.xlu0 %v1019_v7, %s1939_s25 }
0x13a5   :  { %v1022_v20 = vpop.permute.xlu0 %1021 }
0x13a6   :  { %v2315_v21 = vadd.f32 %v1022_v20, %v1014_v40 }
0x13a8   :  { %1886 = vtanh.f32 %v2315_v21 }
0x13ae   :  { %v1887_v22 = vpop.eup %1886 }
0x13af   :  { %1027 = vrot.lane.b32.xlu1 %v1887_v22, %s1938_s22 }
0x1421   :  { %v1028_v31 = vpop.permute.xlu1 %1027 }
0x1422   :  { %v1030_v32 = vmul.f32 %v1028_v31, %v1011_v19 }
0x1424   :  { %1040 = vrot.lane.b32.xlu2 %v1030_v32, %s1939_s25 }
0x147e   :  { %v1041_v33 = vpop.permute.xlu2 %1040 }
0x147f   :  { %1779 = vmatmul.msk.f32.vlgmr.msrb.gmra.mxu2 %vm129_vm1, %v1041_v33  ;;  %1780 = vmatmul.msk.f32.vlgmr.msrb.gmra.mxu1 %vm129_vm1, %v1041_v33 }
0x1480   :  { %1211 = vmatpush.msrb.mxu2 %v2177_v3 }
0x1482   :  { %1212 = vmatpush.msrb.mxu2 %v2182_v4 }
0x1484   :  { %1213 = vmatpush.msrb.mxu2 %v2189_v5 }
0x1486   :  { %1214 = vmatpush.msrb.mxu2 %v2196_v6 }
0x1487   :  { %1781 = vmatmul.msk.f32.vlgmr.msra.gmra.mxu2 %vm129_vm1, %v1041_v33 }
0x1488   :  { %1324 = vmatpush.msra.mxu2 %v2177_v3 }
0x148a   :  { %1325 = vmatpush.msra.mxu2 %v2182_v4 }
0x148c   :  { %1326 = vmatpush.msra.mxu2 %v2189_v5 }
0x148e   :  { %1327 = vmatpush.msra.mxu2 %v2196_v6 }
0x1502   :  { %v1061_v36 = vpop.f32.mrf.mxu2 }
0x1503   :  { %v2364_v37 = vadd.f32 %v1061_v36, %v2309_v56 }
0x150a   :  { %v1103_v42 = vpop.f32.mrf.mxu2 }
0x150b   :  { %v1106_v43 = vadd.f32 %v1103_v42, %v722_v39  ;;  %v1263_v42 = vld [vmem:[%s2655_s9 + $0x130] sm:$0xff] }
0x150c   :  { %1282 = vmatpush.msrb.mxu0 %v1263_v42 }
0x150d   :  { %1888 = vtanh.f32 %v1106_v43  ;;  %v1782_v45 = vmul.f32 -1.442695, %v1106_v43  ;;  %v1264_v43 = vld [vmem:[%s2655_s9 + $0x138] sm:$0xff] }
0x150e   :  { %1302 = vmatpush.msrb.mxu1 %v1264_v43 }
0x150f   :  { %1890 = vpow2.f32 %v1782_v45  ;;  %v1262_v45 = vld [vmem:[%s2655_s9 + $0x128] sm:$0xff] }
0x1510   :  { %1303 = vmatpush.msrb.mxu1 %v1262_v45 }
0x1513   :  { %v1889_v44 = vpop.eup %1888 }
0x1514   :  { %1129 = vrot.lane.b32.xlu0 %v1889_v44, %s1938_s22  ;;  %v1261_v44 = vld [vmem:[%s2655_s9 + $0x120] sm:$0xff] }
0x1515   :  { %v1891_v46 = vpop.eup %1890  ;;  %1283 = vmatpush.msrb.mxu0 %v1261_v44 }
0x1516   :  { %v1110_v47 = vadd.f32 1.0, %v1891_v46  ;;  %v1259_v46 = vld [vmem:[%s2655_s9 + $0x110] sm:$0xff] }
0x1517   :  { %1284 = vmatpush.msrb.mxu0 %v1259_v46 }
0x1518   :  { %1892 = vrcp.f32 %v1110_v47  ;;  %v1122_v53 = vand.u32 2147483648, %v1110_v47  ;;  %vm1116_vm13 = vweird.f32 %v1110_v47  ;;  %v1120_v54 = vand.u32 2147483647, %v1110_v47 }
0x151a   :  { %v1123_v56 = vor.u32 1.1754944e-38, %v1122_v53  ;;  %vm1121_vm15 = vcmp.eq.f32.partialorder %v1120_v54, 8.507059e+37  ;;  %v727_v53 = vpop.f32.mrf.mxu3 }
0x151b   :  { %v728_v54 = vadd.f32 %v2214_v14, %v727_v53 }
0x151e   :  { %v1893_v48 = vpop.eup %1892 }
0x151f   :  { %v1112_v49 = vmul.f32 %v1893_v48, %v1110_v47  ;;  %vm1117_vm12 = vweird.f32 %v1893_v48  ;;  %v1260_v47 = vld [vmem:[%s2655_s9 + $0x118] sm:$0xff] }
0x1520   :  { %vm1118_vm14 = vmor %vm1116_vm13, %vm1117_vm12  ;;  %1304 = vmatpush.msrb.mxu1 %v1260_v47 }
0x1521   :  { %v1113_v50 = vsub.f32 1.0, %v1112_v49  ;;  %v1258_v49 = vld [vmem:[%s2655_s9 + $0x108] sm:$0xff] }
0x1522   :  { %1305 = vmatpush.msrb.mxu1 %v1258_v49  ;;  %v730_v53 = vpop.f32.mrf.mxu3 }
0x1523   :  { %v1114_v51 = vmul.f32 %v1893_v48, %v1113_v50 }
0x1525   :  { %v1115_v52 = vadd.f32 %v1893_v48, %v1114_v51 }
0x1527   :  { %v1119_v55 = vsel %vm1118_vm14, %v1893_v48, %v1115_v52  ;;  %v1257_v48 = vld [vmem:[%s2655_s9 + $0x100] sm:$0xff] }
0x1528   :  { %v1124_v58 = vsel %vm1121_vm15, %v1123_v56, %v1119_v55  ;;  %1285 = vmatpush.msrb.mxu0 %v1257_v48 }
0x1529   :  { %v1127_v61 = vmul.f32 %v1124_v58, %v2315_v21 }
0x1586   :  { %v1130_v57 = vpop.permute.xlu0 %1129 }
0x1587   :  { %v1132_v60 = vmul.f32 %v1130_v57, %v1124_v58 }
0x1589   :  { %1134 = vrot.lane.b32.xlu1 %v1132_v60, %s1939_s25 }
0x15fb   :  { %v1135_v62 = vpop.permute.xlu1 %1134 }
0x15fc   :  { %v1137_v0 = vadd.f32 %v1135_v62, %v1127_v61 }
0x15fe   :  { %1894 = vtanh.f32 %v1137_v0 }
0x1604   :  { %v1895_v1 = vpop.eup %1894 }
0x1605   :  { %1140 = vrot.lane.b32.xlu2 %v1895_v1, %s1938_s22 }
0x165f   :  { %v1141_v11 = vpop.permute.xlu2 %1140 }
0x1660   :  { %v1143_v12 = vmul.f32 %v1141_v11, %v1124_v58 }
0x1662   :  { %1153 = vrot.lane.b32.xlu0 %v1143_v12, %s1939_s25  ;;  %v1936_v12 = vld [vmem:[%s2649_s5] ss:$0 sm:$0xff] }
0x1663   :  { %v121_v15 = vadd.f32 %v1936_v12, %v2103_v41 }
0x16d4   :  { %v2384_v13 = vpop.permute.xlu0 %1153 }
0x16d5   :  { %1784 = vmatmul.msk.f32.vlgmr.msra.gmra.mxu1 %vm129_vm1, %v2384_v13  ;;  %1785 = vmatmul.msk.f32.vlgmr.msrb.gmra.mxu2 %vm129_vm1, %v2384_v13 }
0x16d6   :  { %1437 = vmatpush.msrb.mxu2 %v2177_v3 }
0x16d8   :  { %1438 = vmatpush.msrb.mxu2 %v2182_v4 }
0x16da   :  { %1439 = vmatpush.msrb.mxu2 %v2189_v5 }
0x16dc   :  { %1440 = vmatpush.msrb.mxu2 %v2196_v6 }
0x1758   :  { %v1216_v17 = vpop.f32.mrf.mxu2 }
0x1759   :  { %v1219_v18 = vadd.f32 %v1216_v17, %v725_v16  ;;  %v612_v17 = vadd.f32 %v2240_v9, %v121_v15 }
0x175b   :  { %1896 = vtanh.f32 %v1219_v18  ;;  %v1786_v7 = vmul.f32 -1.442695, %v1219_v18 }
0x175d   :  { %1898 = vpow2.f32 %v1786_v7 }
0x1761   :  { %v1897_v19 = vpop.eup %1896 }
0x1762   :  { %1242 = vrot.lane.b32.xlu1 %v1897_v19, %s1938_s22 }
0x1763   :  { %v1899_v40 = vpop.eup %1898 }
0x1764   :  { %v1223_v20 = vadd.f32 1.0, %v1899_v40 }
0x1766   :  { %1900 = vrcp.f32 %v1223_v20  ;;  %v1235_v26 = vand.u32 2147483648, %v1223_v20  ;;  %vm1229_vm3 = vweird.f32 %v1223_v20  ;;  %v1233_v27 = vand.u32 2147483647, %v1223_v20 }
0x1768   :  { %v1236_v29 = vor.u32 1.1754944e-38, %v1235_v26  ;;  %vm1234_vm5 = vcmp.eq.f32.partialorder %v1233_v27, 8.507059e+37  ;;  %v1377_v26 = vld [vmem:[%s2655_s9 + $0x178] sm:$0xff]  ;;  %v1374_v27 = vld [vmem:[%s2655_s9 + $0x160] sm:$0xff] }
0x1769   :  { %1415 = vmatpush.msra.mxu1 %v1377_v26 }
0x176c   :  { %v1901_v21 = vpop.eup %1900 }
0x176d   :  { %v1225_v22 = vmul.f32 %v1901_v21, %v1223_v20  ;;  %vm1230_vm2 = vweird.f32 %v1901_v21 }
0x176e   :  { %vm1231_vm4 = vmor %vm1229_vm3, %vm1230_vm2 }
0x176f   :  { %v1226_v23 = vsub.f32 1.0, %v1225_v22 }
0x1771   :  { %v1227_v24 = vmul.f32 %v1901_v21, %v1226_v23  ;;  %v1758_v23 = vmul.f32 -1.442695, %v612_v17 }
0x1773   :  { %v1228_v25 = vadd.f32 %v1901_v21, %v1227_v24 }
0x1775   :  { %v1232_v28 = vsel %vm1231_vm4, %v1901_v21, %v1228_v25  ;;  %v1376_v25 = vld [vmem:[%s2655_s9 + $0x170] sm:$0xff] }
0x1776   :  { %v1237_v31 = vsel %vm1234_vm5, %v1236_v29, %v1232_v28  ;;  %1395 = vmatpush.msra.mxu0 %v1376_v25  ;;  %v1375_v28 = vld [vmem:[%s2655_s9 + $0x168] sm:$0xff]  ;;  %v1372_v29 = vld [vmem:[%s2655_s9 + $0x150] sm:$0xff] }
0x1777   :  { %v1240_v33 = vmul.f32 %v1237_v31, %v1137_v0  ;;  %1416 = vmatpush.msra.mxu1 %v1375_v28  ;;  %v1487_v28 = vld [vmem:[%s2655_s9 + $0x1a0] sm:$0xff] }
0x1778   :  { %1396 = vmatpush.msra.mxu0 %v1374_v27  ;;  %v1490_v27 = vld [vmem:[%s2655_s9 + $0x1b8] sm:$0xff] }
0x177a   :  { %1397 = vmatpush.msra.mxu0 %v1372_v29  ;;  %v1485_v29 = vld [vmem:[%s2655_s9 + $0x190] sm:$0xff] }
0x17d4   :  { %v1243_v30 = vpop.permute.xlu1 %1242 }
0x17d5   :  { %v1245_v32 = vmul.f32 %v1243_v30, %v1237_v31  ;;  %v1373_v30 = vld [vmem:[%s2655_s9 + $0x158] sm:$0xff] }
0x17d6   :  { %1417 = vmatpush.msra.mxu1 %v1373_v30  ;;  %v1486_v30 = vld [vmem:[%s2655_s9 + $0x198] sm:$0xff] }
0x17d7   :  { %1247 = vrot.lane.b32.xlu2 %v1245_v32, %s1939_s25 }
0x1831   :  { %v1248_v36 = vpop.permute.xlu2 %1247 }
0x1832   :  { %v1250_v38 = vadd.f32 %v1248_v36, %v1240_v33 }
0x1834   :  { %1902 = vtanh.f32 %v1250_v38 }
0x183a   :  { %v1903_v39 = vpop.eup %1902 }
0x183b   :  { %1253 = vrot.lane.b32.xlu0 %v1903_v39, %s1938_s22 }
0x18ad   :  { %v1254_v50 = vpop.permute.xlu0 %1253 }
0x18ae   :  { %v1256_v51 = vmul.f32 %v1254_v50, %v1237_v31  ;;  %v1370_v31 = vld [vmem:[%s2655_s9 + $0x140] sm:$0xff] }
0x18af   :  { %1398 = vmatpush.msra.mxu0 %v1370_v31  ;;  %v1483_v31 = vld [vmem:[%s2655_s9 + $0x180] sm:$0xff] }
0x18b0   :  { %1266 = vrot.lane.b32.xlu1 %v1256_v51, %s1939_s25  ;;  %v1371_v51 = vld [vmem:[%s2655_s9 + $0x148] sm:$0xff] }
0x18b1   :  { %1418 = vmatpush.msra.mxu1 %v1371_v51 }
0x1922   :  { %v1267_v52 = vpop.permute.xlu1 %1266 }
0x1923   :  { %1787 = vmatmul.msk.f32.vlgmr.msrb.gmra.mxu0 %vm129_vm1, %v1267_v52  ;;  %1788 = vmatmul.msk.f32.vlgmr.msrb.gmra.mxu1 %vm129_vm1, %v1267_v52 }
0x1924   :  { %1789 = vmatmul.msk.f32.vlgmr.msra.gmra.mxu2 %vm129_vm1, %v1267_v52  ;;  %1550 = vmatpush.msrb.mxu1 %v2177_v3 }
0x1925   :  { %1528 = vmatpush.msrb.mxu0 %v1490_v27  ;;  %v1680_v27 = vld [vmem:[%s2656_s11 + $0x98] sm:$0xff] }
0x1926   :  { %1551 = vmatpush.msrb.mxu1 %v2182_v4 }
0x1928   :  { %1552 = vmatpush.msrb.mxu1 %v2189_v5 }
0x192a   :  { %1553 = vmatpush.msrb.mxu1 %v2196_v6 }
0x19a7   :  { %v1329_v55 = vpop.f32.mrf.mxu2 }
0x19a8   :  { %v1332_v56 = vadd.f32 %v1329_v55, %v728_v54  ;;  %v731_v54 = vadd.f32 %v2214_v14, %v730_v53 }
0x19aa   :  { %1904 = vtanh.f32 %v1332_v56  ;;  %v1790_v58 = vmul.f32 -1.442695, %v1332_v56 }
0x19ac   :  { %1906 = vpow2.f32 %v1790_v58 }
0x19b0   :  { %v1905_v57 = vpop.eup %1904 }
0x19b1   :  { %1355 = vrot.lane.b32.xlu2 %v1905_v57, %s1938_s22 }
0x19b2   :  { %v1907_v60 = vpop.eup %1906 }
0x19b3   :  { %v1336_v61 = vadd.f32 1.0, %v1907_v60 }
0x19b5   :  { %1908 = vrcp.f32 %v1336_v61  ;;  %v1348_v8 = vand.u32 2147483648, %v1336_v61  ;;  %vm1342_vm7 = vweird.f32 %v1336_v61  ;;  %v1346_v10 = vand.u32 2147483647, %v1336_v61 }
0x19b6   :  { %1910 = vtanh.f32 %v612_v17 }
0x19b7   :  { %v1349_v16 = vor.u32 1.1754944e-38, %v1348_v8  ;;  %vm1347_vm8 = vcmp.eq.f32.partialorder %v1346_v10, 8.507059e+37 }
0x19bb   :  { %v1909_v62 = vpop.eup %1908 }
0x19bc   :  { %v1338_v0 = vmul.f32 %v1909_v62, %v1336_v61  ;;  %vm1343_vm6 = vweird.f32 %v1909_v62  ;;  %v1911_v40 = vpop.eup %1910 }
0x19bd   :  { %vm1344_vm0 = vmor %vm1342_vm7, %vm1343_vm6  ;;  %vm1729_vm7 = vcmask 15360  }
0x19be   :  { %v1339_v1 = vsub.f32 1.0, %v1338_v0 }
0x19c0   :  { %v1340_v2 = vmul.f32 %v1909_v62, %v1339_v1 }
0x19c2   :  { %v1341_v63 = vadd.f32 %v1909_v62, %v1340_v2 }
0x19c4   :  { %v1345_v11 = vsel %vm1344_vm0, %v1909_v62, %v1341_v63 }
0x19c5   :  { %v1350_v19 = vsel %vm1347_vm8, %v1349_v16, %v1345_v11 }
0x19c6   :  { %v1353_v20 = vmul.f32 %v1350_v19, %v1250_v38 }
0x1a0b   :  { %v1356_v18 = vpop.permute.xlu2 %1355 }
0x1a0c   :  { %v1358_v7 = vmul.f32 %v1356_v18, %v1350_v19  ;;  %v1150_v18 = vld [vmem:[%s2655_s9 + $0xf0] sm:$0xff] }
0x1a0d   :  { %1169 = vmatpush.msrb.mxu3 %v1150_v18  ;;  %v1675_v18 = vld [vmem:[%s2656_s11 + $0x70] sm:$0xff] }
0x1a0e   :  { %1360 = vrot.lane.b32.xlu0 %v1358_v7, %s1939_s25  ;;  %v1146_v7 = vld [vmem:[%s2655_s9 + $0xd0] sm:$0xff] }
0x1a16   :  { %635 = vrot.lane.b32.xlu0 %v1911_v40, %s1938_s22  ;;  %v1144_v40 = vld [vmem:[%s2655_s9 + $0xc0] sm:$0xff] }
0x1a80   :  { %v1361_v21 = vpop.permute.xlu0 %1360 }
0x1a81   :  { %v2435_v22 = vadd.f32 %v1361_v21, %v1353_v20 }
0x1a83   :  { %1912 = vtanh.f32 %v2435_v22 }
0x1a84   :  { %1914 = vpow2.f32 %v1758_v23 }
0x1a88   :  { %v636_v48 = vpop.permute.xlu0 %635 }
0x1a89   :  { %v1913_v41 = vpop.eup %1912 }
0x1a8a   :  { %1366 = vrot.lane.b32.xlu1 %v1913_v41, %s1938_s22  ;;  %v1915_v9 = vpop.eup %1914 }
0x1a8b   :  { %v616_v24 = vadd.f32 1.0, %v1915_v9 }
0x1a8d   :  { %1916 = vrcp.f32 %v616_v24  ;;  %v628_v44 = vand.u32 2147483648, %v616_v24  ;;  %vm622_vm10 = vweird.f32 %v616_v24  ;;  %v626_v45 = vand.u32 2147483647, %v616_v24 }
0x1a8f   :  { %v629_v47 = vor.u32 1.1754944e-38, %v628_v44  ;;  %vm627_vm12 = vcmp.eq.f32.partialorder %v626_v45, 8.507059e+37  ;;  %v1937_v44 = vld [vmem:[%s2653_s8] ss:$0 sm:$0xff] }
0x1a93   :  { %v1917_v32 = vpop.eup %1916 }
0x1a94   :  { %v618_v33 = vmul.f32 %v1917_v32, %v616_v24  ;;  %vm623_vm9 = vweird.f32 %v1917_v32 }
0x1a95   :  { %vm624_vm11 = vmor %vm622_vm10, %vm623_vm9 }
0x1a96   :  { %v619_v36 = vsub.f32 1.0, %v618_v33 }
0x1a98   :  { %v620_v38 = vmul.f32 %v1917_v32, %v619_v36  ;;  %v2527_v36 = vpop.f32.mrf.mxu1 }
0x1a9a   :  { %v621_v42 = vadd.f32 %v1917_v32, %v620_v38 }
0x1a9c   :  { %v625_v46 = vsel %vm624_vm11, %v1917_v32, %v621_v42  ;;  %v1484_v32 = vld [vmem:[%s2655_s9 + $0x188] sm:$0xff] }
0x1a9d   :  { %v630_v49 = vsel %vm627_vm12, %v629_v47, %v625_v46 }
0x1a9e   :  { %v638_v50 = vmul.f32 %v636_v48, %v630_v49  ;;  %v633_v4 = vmul.f32 %v630_v49, %v2227_v59 }
0x1aa0   :  { %v2529_v38 = vpop.f32.mrf.mxu1 }
0x1afc   :  { %v1367_v39 = vpop.permute.xlu1 %1366 }
0x1afd   :  { %v1369_v43 = vmul.f32 %v1367_v39, %v1350_v19  ;;  %v1148_v19 = vld [vmem:[%s2655_s9 + $0xe0] sm:$0xff]  ;;  %v2531_v39 = vpop.f32.mrf.mxu1 }
0x1afe   :  { %1170 = vmatpush.msrb.mxu3 %v1148_v19  ;;  %v1674_v19 = vld [vmem:[%s2656_s11 + $0x68] sm:$0xff] }
0x1aff   :  { %1379 = vrot.lane.b32.xlu2 %v1369_v43, %s1939_s25 }
0x1b00   :  { %1171 = vmatpush.msrb.mxu3 %v1146_v7  ;;  %v1673_v7 = vld [vmem:[%s2656_s11 + $0x60] sm:$0xff] }
0x1b02   :  { %1172 = vmatpush.msrb.mxu3 %v1144_v40  ;;  %v1672_v40 = vld [vmem:[%s2656_s11 + $0x58] sm:$0xff] }
0x1b07   :  { %640 = vrot.lane.b32.xlu2 %v638_v50, %s1939_s25 }
0x1b59   :  { %v1380_v52 = vpop.permute.xlu2 %1379 }
0x1b5a   :  { %1791 = vmatmul.msk.f32.vlgmr.msra.gmra.mxu0 %vm129_vm1, %v1380_v52  ;;  %1792 = vmatmul.msk.f32.vlgmr.msra.gmra.mxu1 %vm129_vm1, %v1380_v52 }
0x1b5b   :  { %1793 = vmatmul.msk.f32.vlgmr.msrb.gmra.mxu2 %vm129_vm1, %v1380_v52  ;;  %1720 = vmatpush.msra.mxu1 %v1680_v27 }
0x1b61   :  { %v641_v3 = vpop.permute.xlu2 %640 }
0x1b62   :  { %v643_v57 = vadd.f32 %v641_v3, %v633_v4 }
0x1bd7   :  { %v2533_v42 = vpop.f32.mrf.mxu1 }
0x1bde   :  { %v1442_v55 = vpop.f32.mrf.mxu2 }
0x1bdf   :  { %v1445_v56 = vadd.f32 %v1442_v55, %v731_v54 }
0x1be1   :  { %1918 = vtanh.f32 %v1445_v56  ;;  %v1794_v58 = vmul.f32 -1.442695, %v1445_v56 }
0x1be2   :  { %1920 = vtanh.f32 %v643_v57 }
0x1be3   :  { %1922 = vpow2.f32 %v1794_v58 }
0x1be7   :  { %v1919_v5 = vpop.eup %1918 }
0x1be8   :  { %1468 = vrot.lane.b32.xlu1 %v1919_v5, %s1938_s22  ;;  %v1921_v6 = vpop.eup %1920 }
0x1be9   :  { %v1923_v60 = vpop.eup %1922 }
0x1bea   :  { %v1449_v61 = vadd.f32 1.0, %v1923_v60 }
0x1bec   :  { %1924 = vrcp.f32 %v1449_v61  ;;  %v1461_v59 = vand.u32 2147483648, %v1449_v61  ;;  %vm1455_vm14 = vweird.f32 %v1449_v61  ;;  %v1459_v63 = vand.u32 2147483647, %v1449_v61 }
0x1bee   :  { %v1462_v10 = vor.u32 1.1754944e-38, %v1461_v59  ;;  %vm1460_vm2 = vcmp.eq.f32.partialorder %v1459_v63, 8.507059e+37  ;;  %v1600_v59 = vld [vmem:[%s2655_s9 + $0x1e0] sm:$0xff]  ;;  %v1601_v63 = vld [vmem:[%s2655_s9 + $0x1e8] sm:$0xff] }
0x1bf0   :  { %646 = vrot.lane.b32.xlu1 %v1921_v6, %s1938_s22 }
0x1bf2   :  { %v1925_v14 = vpop.eup %1924 }
0x1bf3   :  { %v1451_v62 = vmul.f32 %v1925_v14, %v1449_v61  ;;  %vm1456_vm13 = vweird.f32 %v1925_v14 }
0x1bf4   :  { %vm1457_vm15 = vmor %vm1455_vm14, %vm1456_vm13 }
0x1bf5   :  { %v1452_v0 = vsub.f32 1.0, %v1451_v62 }
0x1bf7   :  { %v1453_v1 = vmul.f32 %v1925_v14, %v1452_v0 }
0x1bf9   :  { %v1454_v2 = vadd.f32 %v1925_v14, %v1453_v1  ;;  %v1602_v1 = vld [vmem:[%s2655_s9 + $0x1f0] sm:$0xff] }
0x1bfa   :  { %1621 = vmatpush.msra.mxu2 %v1602_v1 }
0x1bfb   :  { %v1458_v8 = vsel %vm1457_vm15, %v1925_v14, %v1454_v2  ;;  %v1603_v2 = vld [vmem:[%s2655_s9 + $0x1f8] sm:$0xff] }
0x1bfc   :  { %v1463_v12 = vsel %vm1460_vm2, %v1462_v10, %v1458_v8  ;;  %v1598_v8 = vld [vmem:[%s2655_s9 + $0x1d0] sm:$0xff]  ;;  %v1599_v10 = vld [vmem:[%s2655_s9 + $0x1d8] sm:$0xff]  ;;  %1622 = vmatpush.msra.mxu2 %v1600_v59 }
0x1bfd   :  { %v1466_v20 = vmul.f32 %v1463_v12, %v2435_v22  ;;  %v1489_v22 = vld [vmem:[%s2655_s9 + $0x1b0] sm:$0xff] }
0x1bfe   :  { %1508 = vmatpush.msra.mxu3 %v1489_v22  ;;  %1623 = vmatpush.msra.mxu2 %v1598_v8  ;;  %v1664_v22 = vld [vmem:[%s2656_s11 + $0x18] sm:$0xff] }
0x1c00   :  { %1509 = vmatpush.msra.mxu3 %v1487_v28  ;;  %v1663_v28 = vld [vmem:[%s2656_s11 + $0x10] sm:$0xff] }
0x1c02   :  { %1510 = vmatpush.msra.mxu3 %v1485_v29  ;;  %v1662_v29 = vld [vmem:[%s2656_s11 + $0x8] sm:$0xff] }
0x1c04   :  { %1511 = vmatpush.msra.mxu3 %v1483_v31  ;;  %v1661_v31 = vld [vmem:[%s2656_s11] sm:$0xff] }
0x1c5a   :  { %v1469_v11 = vpop.permute.xlu1 %1468 }
0x1c5b   :  { %v1471_v15 = vmul.f32 %v1469_v11, %v1463_v12  ;;  %v1596_v11 = vld [vmem:[%s2655_s9 + $0x1c0] sm:$0xff] }
0x1c5c   :  { %1624 = vmatpush.msra.mxu2 %v1596_v11 }
0x1c5d   :  { %1473 = vrot.lane.b32.xlu0 %v1471_v15, %s1939_s25 }
0x1c62   :  { %v647_v16 = vpop.permute.xlu1 %646 }
0x1c63   :  { %v649_v17 = vmul.f32 %v647_v16, %v630_v49 }
0x1c65   :  { %651 = vrot.lane.b32.xlu0 %v649_v17, %s1939_s25  ;;  %v1676_v17 = vld [vmem:[%s2656_s11 + $0x78] sm:$0xff] }
0x1ccf   :  { %v1474_v21 = vpop.permute.xlu0 %1473 }
0x1cd0   :  { %v2491_v41 = vadd.f32 %v1474_v21, %v1466_v20  ;;  %v1671_v20 = vld [vmem:[%s2656_s11 + $0x50] sm:$0xff]  ;;  %v1670_v21 = vld [vmem:[%s2656_s11 + $0x48] sm:$0xff] }
0x1cd2   :  { %1926 = vtanh.f32 %v2491_v41 }
0x1cd7   :  { %v652_v23 = vpop.permute.xlu0 %651 }
0x1cd8   :  { %v1927_v9 = vpop.eup %1926  ;;  %654 = vst.msk [vmem:[#allocation2 + $0x38] sm:$0xff] %vm129_vm1, %v652_v23  ;;  %v1668_v23 = vld [vmem:[%s2656_s11 + $0x38] sm:$0xff] }
0x1cd9   :  { %1479 = vrot.lane.b32.xlu2 %v1927_v9, %s1938_s22  ;;  %v1667_v9 = vld [vmem:[%s2656_s11 + $0x30] sm:$0xff] }
0x1cdf   :  { %v662_v24 = vld [vmem:[#allocation2 + $0x38] sm:$0xff] }
0x1ce0   :  { %1766 = vmatmul.msk.f32.gmra.mxu3 %vm129_vm1, %v662_v24  ;;  %v1666_v24 = vld [vmem:[%s2656_s11 + $0x28] sm:$0xff] }
0x1ce8   :  { %1783 = vmatmul.msk.f32.vlgmr.msrb.gmra.mxu3 %vm129_vm1, %v2384_v13  ;;  %v1488_v13 = vld [vmem:[%s2655_s9 + $0x1a8] sm:$0xff] }
0x1ce9   :  { %1529 = vmatpush.msrb.mxu0 %v1488_v13  ;;  %1641 = vmatpush.msrb.mxu3 %v1603_v2  ;;  %v1679_v13 = vld [vmem:[%s2656_s11 + $0x90] sm:$0xff] }
0x1cea   :  { %1721 = vmatpush.msra.mxu1 %v1679_v13 }
0x1ceb   :  { %1530 = vmatpush.msrb.mxu0 %v1486_v30  ;;  %1642 = vmatpush.msrb.mxu3 %v1601_v63  ;;  %v1678_v30 = vld [vmem:[%s2656_s11 + $0x88] sm:$0xff] }
0x1cec   :  { %1722 = vmatpush.msra.mxu1 %v1678_v30 }
0x1ced   :  { %1531 = vmatpush.msrb.mxu0 %v1484_v32  ;;  %1643 = vmatpush.msrb.mxu3 %v1599_v10  ;;  %v1677_v32 = vld [vmem:[%s2656_s11 + $0x80] sm:$0xff] }
0x1cee   :  { %1723 = vmatpush.msra.mxu1 %v1677_v32 }
0x1cef   :  { %1688 = vmatpush.msra.mxu0 %v1676_v17 }
0x1cf1   :  { %1689 = vmatpush.msra.mxu0 %v1675_v18 }
0x1cf3   :  { %1690 = vmatpush.msra.mxu0 %v1674_v19 }
0x1cf5   :  { %1691 = vmatpush.msra.mxu0 %v1673_v7 }
0x1cf7   :  { %1692 = vmatpush.msra.mxu0 %v1672_v40 }
0x1cf9   :  { %1693 = vmatpush.msra.mxu0 %v1671_v20 }
0x1cfb   :  { %1694 = vmatpush.msra.mxu0 %v1670_v21 }
0x1d33   :  { %v1480_v25 = vpop.permute.xlu2 %1479 }
0x1d34   :  { %v1482_v26 = vmul.f32 %v1480_v25, %v1463_v12  ;;  %v1597_v12 = vld [vmem:[%s2655_s9 + $0x1c8] sm:$0xff]  ;;  %v1665_v25 = vld [vmem:[%s2656_s11 + $0x20] sm:$0xff] }
0x1d35   :  { %1644 = vmatpush.msrb.mxu3 %v1597_v12 }
0x1d36   :  { %1492 = vrot.lane.b32.xlu1 %v1482_v26, %s1939_s25 }
0x1d63   :  { %v733_v43 = vpop.f32.mrf.mxu3 }
0x1d64   :  { %v734_v45 = vadd.f32 %v1937_v44, %v733_v43 }
0x1d6b   :  { %v1174_v43 = vpop.f32.mrf.mxu3 }
0x1da8   :  { %v1493_v33 = vpop.permute.xlu1 %1492 }
0x1da9   :  { %1795 = vmatmul.msk.f32.vlgmr.msra.gmra.mxu3 %vm129_vm1, %v1493_v33  ;;  %1796 = vmatmul.msk.f32.vlgmr.msrb.gmra.mxu0 %vm129_vm1, %v1493_v33 }
0x1daa   :  { %1797 = vmatmul.msk.f32.vlgmr.msrb.gmra.mxu1 %vm129_vm1, %v1493_v33  ;;  %v1287_v33 = vpop.f32.mrf.mxu0 }
0x1db2   :  { %v1400_v44 = vpop.f32.mrf.mxu0 }
0x1e27   :  { %v1555_v46 = vpop.f32.mrf.mxu1 }
0x1e28   :  { %v1558_v47 = vadd.f32 %v1555_v46, %v734_v45  ;;  %v971_v45 = vadd.f32 %v2361_v35, %v2359_v34  ;;  %v1197_v46 = vadd.f32 %v1174_v43, %v2364_v37 }
0x1e2a   :  { %1928 = vtanh.f32 %v1558_v47  ;;  %v1798_v49 = vmul.f32 -1.442695, %v1558_v47  ;;  %v1085_v47 = vadd.f32 %v2527_v36, %v971_v45 }
0x1e2c   :  { %1930 = vpow2.f32 %v1798_v49  ;;  %v1198_v49 = vadd.f32 %v2529_v38, %v1085_v47 }
0x1e30   :  { %v1929_v48 = vpop.eup %1928 }
0x1e31   :  { %1581 = vrot.lane.b32.xlu2 %v1929_v48, %s1938_s22  ;;  %v1513_v48 = vpop.f32.mrf.mxu3 }
0x1e32   :  { %v1931_v50 = vpop.eup %1930 }
0x1e33   :  { %v1562_v51 = vadd.f32 1.0, %v1931_v50  ;;  %v1310_v50 = vadd.f32 %v1287_v33, %v1197_v46 }
0x1e35   :  { %1932 = vrcp.f32 %v1562_v51  ;;  %v1574_v3 = vand.u32 2147483648, %v1562_v51  ;;  %vm1568_vm4 = vweird.f32 %v1562_v51  ;;  %v1572_v4 = vand.u32 2147483647, %v1562_v51 }
0x1e37   :  { %v1575_v5 = vor.u32 1.1754944e-38, %v1574_v3  ;;  %vm1573_vm6 = vcmp.eq.f32.partialorder %v1572_v4, 8.507059e+37 }
0x1e3b   :  { %v1933_v52 = vpop.eup %1932 }
0x1e3c   :  { %v1564_v53 = vmul.f32 %v1933_v52, %v1562_v51  ;;  %vm1569_vm3 = vweird.f32 %v1933_v52  ;;  %v1311_v51 = vadd.f32 %v2531_v39, %v1198_v49 }
0x1e3d   :  { %vm1570_vm5 = vmor %vm1568_vm4, %vm1569_vm3 }
0x1e3e   :  { %v1565_v54 = vsub.f32 1.0, %v1564_v53  ;;  %v1651_v53 = vld [vmem:[%s2658_s10] sm:$0x3] }
0x1e3f   :  { %v1653_v35 = vperm.slane %v1651_v53, 0  ;;  %v1654_v37 = vperm.slane %v1651_v53, 1 }
0x1e40   :  { %v1566_v55 = vmul.f32 %v1933_v52, %v1565_v54  ;;  %v1424_v54 = vadd.f32 %v2533_v42, %v1311_v51  ;;  %v1807_v42 = vld [vmem:[%s2657_s12] ss:$0 sm:$0xff] }
0x1e42   :  { %v1567_v56 = vadd.f32 %v1933_v52, %v1566_v55  ;;  %v1423_v55 = vadd.f32 %v1400_v44, %v1310_v50 }
0x1e44   :  { %v1571_v57 = vsel %vm1570_vm5, %v1933_v52, %v1567_v56  ;;  %v1533_v52 = vpop.f32.mrf.mxu0  ;;  %v1536_v34 = vadd.f32 %v1513_v48, %v1423_v55 }
0x1e45   :  { %v1576_v58 = vsel %vm1573_vm6, %v1575_v5, %v1571_v57  ;;  %v1537_v56 = vadd.f32 %v1533_v52, %v1424_v54 }
0x1e46   :  { %v1579_v61 = vmul.f32 %v1576_v58, %v2491_v41  ;;  %v1669_v41 = vld [vmem:[%s2656_s11 + $0x40] sm:$0xff] }
0x1e47   :  { %1695 = vmatpush.msra.mxu0 %v1669_v41 }
0x1e49   :  { %1696 = vmatpush.msra.mxu0 %v1668_v23 }
0x1e4b   :  { %1697 = vmatpush.msra.mxu0 %v1667_v9 }
0x1e4d   :  { %1698 = vmatpush.msra.mxu0 %v1666_v24 }
0x1e4f   :  { %1699 = vmatpush.msra.mxu0 %v1665_v25 }
0x1e51   :  { %1700 = vmatpush.msra.mxu0 %v1664_v22 }
0x1e53   :  { %1701 = vmatpush.msra.mxu0 %v1663_v28 }
0x1e55   :  { %1702 = vmatpush.msra.mxu0 %v1662_v29 }
0x1e57   :  { %1703 = vmatpush.msra.mxu0 %v1661_v31 }
0x1e8b   :  { %v1582_v6 = vpop.permute.xlu2 %1581 }
0x1e8c   :  { %v1584_v60 = vmul.f32 %v1582_v6, %v1576_v58 }
0x1e8e   :  { %1586 = vrot.lane.b32.xlu0 %v1584_v60, %s1939_s25 }
0x1f00   :  { %v1587_v14 = vpop.permute.xlu0 %1586 }
0x1f01   :  { %v1589_v62 = vadd.f32 %v1587_v14, %v1579_v61 }
0x1f03   :  { %1934 = vtanh.f32 %v1589_v62 }
0x1f09   :  { %v1935_v0 = vpop.eup %1934 }
0x1f0a   :  { %1592 = vrot.lane.b32.xlu1 %v1935_v0, %s1938_s22 }
0x1f7c   :  { %v1593_v15 = vpop.permute.xlu1 %1592 }
0x1f7d   :  { %v1595_v16 = vmul.f32 %v1593_v15, %v1576_v58 }
0x1f7f   :  { %1605 = vrot.lane.b32.xlu2 %v1595_v16, %s1939_s25 }
0x1fd9   :  { %v1606_v26 = vpop.permute.xlu2 %1605 }
0x1fda   :  { %1799 = vmatmul.msk.f32.vlgmr.msra.gmra.mxu2 %vm129_vm1, %v1606_v26  ;;  %1800 = vmatmul.msk.f32.vlgmr.msrb.gmra.mxu3 %vm129_vm1, %v1606_v26 }
0x205d   :  { %v1626_v3 = vpop.f32.mrf.mxu2  ;;  %v1646_v36 = vpop.f32.mrf.mxu3 }
0x205e   :  { %v1649_v4 = vadd.f32 %v1626_v3, %v1536_v34  ;;  %v1650_v57 = vadd.f32 %v1646_v36, %v1537_v56 }
0x2060   :  { %v1657_v38 = vadd.f32 %v1653_v35, %v1649_v4  ;;  %v1658_v5 = vadd.f32 %v1654_v37, %v1650_v57 }
0x2062   :  { %v1659_v6 = vmax.f32 %v1657_v38, 0.0  ;;  %v1660_v39 = vmax.f32 %v1658_v5, 0.0 }
0x2064   :  { %1704 = vmatmul.f32.vlgmr.msra.gmra.mxu0 %v1659_v6  ;;  %1801 = vmatmul.msk.f32.vlgmr.msra.gmra.mxu1 %vm129_vm1, %v1660_v39 }
0x20e1   :  { %v1705_v58 = vpop.f32.mrf.mxu0  ;;  %v1725_v61 = vpop.f32.mrf.mxu1 }
0x20e2   :  { %v1706_v60 = vadd.f32 %v1807_v42, %v1705_v58 }
0x20e4   :  { %v1726_v14 = vadd.f32 %v1725_v61, %v1706_v60 }
0x20e6   :  { %v1728_v62 = vmax.f32 %v1726_v14, 0.0 }
0x20e8   :  { %1730 = vst.msk [vmem:[%s2659_s13] sm:$0xff] %vm1729_vm7, %v1728_v62 }

</bundles_post_ra>
